<compile_context>
chip_gen: v5e
topology: v5e:2x2
jax: 0.10.0
libtpu: 0.0.40
codegen_flags: <defaults>
</compile_context>

<pallas_src>
import functools
import math

import jax
import jax.numpy as jnp
from jax.experimental import pallas as pl
from jax.experimental.pallas import tpu as pltpu

# ---------------- configuration (small, consistent with the module) ----------
EMBED_DIM = 32
NUM_HEADS = 4
HIDDEN_DIM = 64
HEAD_DIM = EMBED_DIM // NUM_HEADS
LN_EPS = 1e-5


# ---------------- the fused decoder-layer kernel ------------------------------
def decoder_layer_kernel(xc_ref, xs_ref, cpos_ref, spos_ref,
                         wE_ref, w2_ref, b64_ref, b32_ref,
                         out_ref, *, batch, lq, lk):
    f32 = jnp.float32
    E = EMBED_DIM
    D = HEAD_DIM

    # ---- activations (already flattened to (B*L, E) by the wrapper) ----------
    x = xc_ref[...]                       # (B*Lq, E)  content
    cpos = cpos_ref[...]                  # (B*Lq, E)
    style = xs_ref[...]                   # (B*Lk, E)
    key2d = style + spos_ref[...]         # key   = enc_style + style_pos
    val2d = style                         # value = enc_style

    # ---- packed parameters: static slices of the slabs (all tile-aligned) ----
    w_q1 = wE_ref[:, 0 * E:1 * E]         # scaled sa_wq^T
    w_q2 = wE_ref[:, 1 * E:2 * E]         # scaled ca_wq^T
    w_kb = wE_ref[:, 2 * E:4 * E]         # [sa_wk^T | ca_wk^T]
    w_vb = wE_ref[:, 4 * E:6 * E]         # [sa_wv^T | ca_wv^T]
    w_o1 = wE_ref[:, 6 * E:7 * E]         # sa_wo^T
    w_o2 = wE_ref[:, 7 * E:8 * E]         # ca_wo^T
    w_f1 = wE_ref[:, 8 * E:8 * E + HIDDEN_DIM]   # fc1_w^T
    w_f2 = w2_ref[...]                    # fc2_w^T

    b_kb = b64_ref[0:1, :]                # [sa_bk | ca_bk]
    b_vb = b64_ref[1:2, :]                # [sa_bv | ca_bv]
    b_f1 = b64_ref[2:3, :]
    b_q1 = b32_ref[0:1, :]                # scaled sa_bq
    b_q2 = b32_ref[1:2, :]                # scaled ca_bq
    b_o1 = b32_ref[2:3, :]
    b_o2 = b32_ref[3:4, :]
    b_f2 = b32_ref[4:5, :]
    g1, be1 = b32_ref[5:6, :], b32_ref[6:7, :]
    g2, be2 = b32_ref[7:8, :], b32_ref[8:9, :]
    g3, be3 = b32_ref[9:10, :], b32_ref[10:11, :]

    # ---- K/V projections fused across both attention blocks (computed once) --
    k_both = jnp.dot(key2d, w_kb, preferred_element_type=f32) + b_kb   # (B*Lk, 2E)
    v_both = jnp.dot(val2d, w_vb, preferred_element_type=f32) + b_vb   # (B*Lk, 2E)
    k1 = k_both[:, :E].reshape(batch, lk, E)
    k2 = k_both[:, E:].reshape(batch, lk, E)
    v1 = v_both[:, :E].reshape(batch, lk, E)
    v2 = v_both[:, E:].reshape(batch, lk, E)

    def layernorm(z, g, b):
        mu = jnp.mean(z, axis=-1, keepdims=True)
        var = jnp.mean((z - mu) ** 2, axis=-1, keepdims=True)
        return (z - mu) * jax.lax.rsqrt(var + LN_EPS) * g + b

    def attention(q2d, k3, v3, w_o, b_o):
        # q2d already carries the 1/sqrt(D) scale (folded into the weights).
        q3 = q2d.reshape(batch, lq, E)
        heads = []
        for h in range(NUM_HEADS):            # static unroll; heads are tiny
            lo, hi = h * D, (h + 1) * D
            s = jnp.einsum('bqd,bkd->bqk', q3[:, :, lo:hi], k3[:, :, lo:hi],
                           preferred_element_type=f32)
            s = s - jnp.max(s, axis=-1, keepdims=True)
            p = jnp.exp(s)
            p = p * pl.reciprocal(jnp.sum(p, axis=-1, keepdims=True), approx=True)
            heads.append(jnp.einsum('bqk,bkd->bqd', p, v3[:, :, lo:hi],
                                    preferred_element_type=f32))
        o = jnp.concatenate(heads, axis=-1).reshape(batch * lq, E)
        return jnp.dot(o, w_o, preferred_element_type=f32) + b_o

    # ---- block 1: "self" attention (K/V from style, as written in the module)
    q1 = jnp.dot(x + cpos, w_q1, preferred_element_type=f32) + b_q1
    x = layernorm(x + attention(q1, k1, v1, w_o1, b_o1), g1, be1)   # dropout1 = id

    # ---- block 2: cross attention ---------------------------------------------
    q2 = jnp.dot(x + cpos, w_q2, preferred_element_type=f32) + b_q2
    x = layernorm(x + attention(q2, k2, v2, w_o2, b_o2), g2, be2)   # dropout2 = id

    # ---- block 3: feed-forward (relu), dropout = identity ---------------------
    hdn = jnp.maximum(jnp.dot(x, w_f1, preferred_element_type=f32) + b_f1, 0.0)
    ffn = jnp.dot(hdn, w_f2, preferred_element_type=f32) + b_f2
    x = layernorm(x + ffn, g3, be3)                                  # dropout3 = id

    out_ref[...] = x
    # TODO(synk): output last dim is 32 (<128); a lane-dense (4,128) store would
    # need an in-kernel (16,32)->(4,128) relayout — skipped for lowering safety.


# ---------------- host-side parameter packing ---------------------------------
def pack_params(params):
    (sa_wq, sa_bq, sa_wk, sa_bk, sa_wv, sa_bv, sa_wo, sa_bo,
     ca_wq, ca_bq, ca_wk, ca_bk, ca_wv, ca_bv, ca_wo, ca_bo,
     fc1_w, fc1_b, fc2_w, fc2_b,
     ln1_g, ln1_b, ln2_g, ln2_b, ln3_g, ln3_b) = params
    scale = 1.0 / math.sqrt(HEAD_DIM)
    wE = jnp.concatenate([
        (scale * sa_wq).T, (scale * ca_wq).T,       # scaled Q projections
        sa_wk.T, ca_wk.T,                           # fused K (both blocks)
        sa_wv.T, ca_wv.T,                           # fused V (both blocks)
        sa_wo.T, ca_wo.T,                           # output projections
        fc1_w.T,                                    # FFN in
    ], axis=1)                                      # (E, 320)
    w2 = fc2_w.T                                    # (HIDDEN_DIM, E)
    b64 = jnp.concatenate([
        jnp.concatenate([sa_bk, ca_bk], axis=1),
        jnp.concatenate([sa_bv, ca_bv], axis=1),
        fc1_b,
    ], axis=0)                                      # (3, 2E)
    b32 = jnp.concatenate([
        scale * sa_bq, scale * ca_bq,
        sa_bo, ca_bo, fc2_b,
        ln1_g, ln1_b, ln2_g, ln2_b, ln3_g, ln3_b,
    ], axis=0)                                      # (11, E)
    return wE, w2, b64, b32


# ---------------- wrapper ------------------------------------------------------
def decoder_layer(enc_content, enc_style, content_pos, style_pos, params):
    """All activation tensors are (B, L, E) float32. Small shapes -> single
    whole-array VMEM block per operand, no grid."""
    B, Lc, E = enc_content.shape
    Ls = enc_style.shape[1]
    wE, w2, b64, b32 = pack_params(params)

    xc = enc_content.reshape(B * Lc, E)     # free, row-major compatible
    xs = enc_style.reshape(B * Ls, E)
    cp = content_pos.reshape(B * Lc, E)
    sp = style_pos.reshape(B * Ls, E)

    vmem = pl.BlockSpec(memory_space=pltpu.MemorySpace.VMEM)
    kern = functools.partial(decoder_layer_kernel, batch=B, lq=Lc, lk=Ls)
    out = pl.pallas_call(
        kern,
        out_shape=jax.ShapeDtypeStruct((B * Lc, E), jnp.float32),
        in_specs=[vmem] * 8,
        out_specs=vmem,
    )(xc, xs, cp, sp, wE, w2, b64, b32)
    return out.reshape(B, Lc, E)


# ---------------- pure-JAX reference (for correctness check) ------------------
def decoder_layer_ref(enc_content, enc_style, content_pos, style_pos, params):
    (sa_wq, sa_bq, sa_wk, sa_bk, sa_wv, sa_bv, sa_wo, sa_bo,
     ca_wq, ca_bq, ca_wk, ca_bk, ca_wv, ca_bv, ca_wo, ca_bo,
     fc1_w, fc1_b, fc2_w, fc2_b,
     ln1_g, ln1_b, ln2_g, ln2_b, ln3_g, ln3_b) = params

    def ln(x, g, b):
        mu = jnp.mean(x, -1, keepdims=True)
        var = jnp.mean((x - mu) ** 2, -1, keepdims=True)
        return (x - mu) / jnp.sqrt(var + LN_EPS) * g + b

    def mha(q_in, k_in, v_in, wq, bq, wk, bk, wv, bv, wo, bo):
        q = q_in @ wq.T + bq
        k = k_in @ wk.T + bk
        v = v_in @ wv.T + bv
        B, Lq, _ = q.shape
        Lk = k.shape[1]
        qh = q.reshape(B, Lq, NUM_HEADS, HEAD_DIM).transpose(0, 2, 1, 3)
        kh = k.reshape(B, Lk, NUM_HEADS, HEAD_DIM).transpose(0, 2, 1, 3)
        vh = v.reshape(B, Lk, NUM_HEADS, HEAD_DIM).transpose(0, 2, 1, 3)
        s = jnp.einsum('bhqd,bhkd->bhqk', qh / math.sqrt(HEAD_DIM), kh)
        p = jax.nn.softmax(s, axis=-1)
        o = jnp.einsum('bhqk,bhkd->bhqd', p, vh)
        o = o.transpose(0, 2, 1, 3).reshape(B, Lq, EMBED_DIM)
        return o @ wo.T + bo

    x = enc_content
    key = enc_style + style_pos
    value = enc_style
    x = ln(x + mha(x + content_pos, key, value,
                   sa_wq, sa_bq, sa_wk, sa_bk, sa_wv, sa_bv, sa_wo, sa_bo), ln1_g, ln1_b)
    x = ln(x + mha(x + content_pos, key, value,
                   ca_wq, ca_bq, ca_wk, ca_bk, ca_wv, ca_bv, ca_wo, ca_bo), ln2_g, ln2_b)
    h = jax.nn.relu(x @ fc1_w.T + fc1_b)
    x = ln(x + (h @ fc2_w.T + fc2_b), ln3_g, ln3_b)
    return x


# ---------------- deterministic parameter construction ------------------------
def make_params(key):
    ks = iter(jax.random.split(key, 64))

    def w(shape, scale=0.05):
        return (scale * jax.random.normal(next(ks), shape)).astype(jnp.float32)

    def row(dim, scale=0.02):
        # biases / LN params kept 2-D (1, dim) so every operand is >= 2-D
        return (scale * jax.random.normal(next(ks), (1, dim))).astype(jnp.float32)

    def mha_params():
        return (w((EMBED_DIM, EMBED_DIM)), row(EMBED_DIM),   # Wq, bq
                w((EMBED_DIM, EMBED_DIM)), row(EMBED_DIM),   # Wk, bk
                w((EMBED_DIM, EMBED_DIM)), row(EMBED_DIM),   # Wv, bv
                w((EMBED_DIM, EMBED_DIM)), row(EMBED_DIM))   # Wo, bo

    sa = mha_params()
    ca = mha_params()
    fc1 = (w((HIDDEN_DIM, EMBED_DIM)), row(HIDDEN_DIM))
    fc2 = (w((EMBED_DIM, HIDDEN_DIM)), row(EMBED_DIM))
    ln1 = (jnp.ones((1, EMBED_DIM), jnp.float32) + row(EMBED_DIM), row(EMBED_DIM))
    ln2 = (jnp.ones((1, EMBED_DIM), jnp.float32) + row(EMBED_DIM), row(EMBED_DIM))
    ln3 = (jnp.ones((1, EMBED_DIM), jnp.float32) + row(EMBED_DIM), row(EMBED_DIM))
    return sa + ca + fc1 + fc2 + ln1 + ln2 + ln3


if __name__ == "__main__":
    B, L = 2, 8   # batch, sequence length (content and style share L here)
    root = jax.random.PRNGKey(0)
    k_c, k_s, k_cp, k_sp, k_p = jax.random.split(root, 5)

    enc_content = jax.random.normal(k_c, (B, L, EMBED_DIM), jnp.float32)
    enc_style = jax.random.normal(k_s, (B, L, EMBED_DIM), jnp.float32)
    content_pos = 0.1 * jax.random.normal(k_cp, (B, L, EMBED_DIM), jnp.float32)
    style_pos = 0.1 * jax.random.normal(k_sp, (B, L, EMBED_DIM), jnp.float32)

    params = make_params(k_p)

    out = decoder_layer(enc_content, enc_style, content_pos, style_pos, params)
    out = jax.block_until_ready(out)

    ref = decoder_layer_ref(enc_content, enc_style, content_pos, style_pos, params)
    assert out.shape == (B, L, EMBED_DIM)
    # slightly relaxed tolerance: softmax uses the EUP approximate reciprocal
    assert jnp.allclose(out, ref, atol=5e-3, rtol=5e-3), "mismatch vs JAX reference"

    print("KERNEL_OK")
</pallas_src>

<mosaic_0001>
module attributes {stable_mosaic.version = 11 : i64} {
  func.func @decoder_layer_kernel(%arg0: memref<16x32xf32, #tpu.memory_space<vmem>>, %arg1: memref<16x32xf32, #tpu.memory_space<vmem>>, %arg2: memref<16x32xf32, #tpu.memory_space<vmem>>, %arg3: memref<16x32xf32, #tpu.memory_space<vmem>>, %arg4: memref<32x320xf32, #tpu.memory_space<vmem>>, %arg5: memref<64x32xf32, #tpu.memory_space<vmem>>, %arg6: memref<3x64xf32, #tpu.memory_space<vmem>>, %arg7: memref<11x32xf32, #tpu.memory_space<vmem>>, %arg8: memref<16x32xf32, #tpu.memory_space<vmem>>) attributes {dimension_semantics = [], scalar_prefetch = 0 : i64, scratch_operands = 0 : i64, tpu.core_type = #tpu.core_type<tc>} {
    %c0 = arith.constant 0 : index
    %c0_0 = arith.constant 0 : index
    %0 = vector.load %arg0[%c0, %c0_0] : memref<16x32xf32, #tpu.memory_space<vmem>>, vector<16x32xf32>
    %c0_1 = arith.constant 0 : index
    %c0_2 = arith.constant 0 : index
    %1 = vector.load %arg2[%c0_1, %c0_2] : memref<16x32xf32, #tpu.memory_space<vmem>>, vector<16x32xf32>
    %c0_3 = arith.constant 0 : index
    %c0_4 = arith.constant 0 : index
    %2 = vector.load %arg1[%c0_3, %c0_4] : memref<16x32xf32, #tpu.memory_space<vmem>>, vector<16x32xf32>
    %c0_5 = arith.constant 0 : index
    %c0_6 = arith.constant 0 : index
    %3 = vector.load %arg3[%c0_5, %c0_6] : memref<16x32xf32, #tpu.memory_space<vmem>>, vector<16x32xf32>
    %4 = arith.addf %2, %3 : vector<16x32xf32>
    %c0_7 = arith.constant 0 : index
    %c0_8 = arith.constant 0 : index
    %5 = vector.load %arg4[%c0_7, %c0_8] : memref<32x320xf32, #tpu.memory_space<vmem>>, vector<32x32xf32>
    %c0_9 = arith.constant 0 : index
    %c32 = arith.constant 32 : index
    %6 = vector.load %arg4[%c0_9, %c32] : memref<32x320xf32, #tpu.memory_space<vmem>>, vector<32x32xf32>
    %c0_10 = arith.constant 0 : index
    %c64 = arith.constant 64 : index
    %7 = vector.load %arg4[%c0_10, %c64] : memref<32x320xf32, #tpu.memory_space<vmem>>, vector<32x64xf32>
    %c0_11 = arith.constant 0 : index
    %c128 = arith.constant 128 : index
    %8 = vector.load %arg4[%c0_11, %c128] : memref<32x320xf32, #tpu.memory_space<vmem>>, vector<32x64xf32>
    %c0_12 = arith.constant 0 : index
    %c192 = arith.constant 192 : index
    %9 = vector.load %arg4[%c0_12, %c192] : memref<32x320xf32, #tpu.memory_space<vmem>>, vector<32x32xf32>
    %c0_13 = arith.constant 0 : index
    %c224 = arith.constant 224 : index
    %10 = vector.load %arg4[%c0_13, %c224] : memref<32x320xf32, #tpu.memory_space<vmem>>, vector<32x32xf32>
    %c0_14 = arith.constant 0 : index
    %c256 = arith.constant 256 : index
    %11 = vector.load %arg4[%c0_14, %c256] : memref<32x320xf32, #tpu.memory_space<vmem>>, vector<32x64xf32>
    %c0_15 = arith.constant 0 : index
    %c0_16 = arith.constant 0 : index
    %12 = vector.load %arg5[%c0_15, %c0_16] : memref<64x32xf32, #tpu.memory_space<vmem>>, vector<64x32xf32>
    %c0_17 = arith.constant 0 : index
    %c0_18 = arith.constant 0 : index
    %13 = vector.load %arg6[%c0_17, %c0_18] : memref<3x64xf32, #tpu.memory_space<vmem>>, vector<1x64xf32>
    %c1 = arith.constant 1 : index
    %c0_19 = arith.constant 0 : index
    %14 = vector.load %arg6[%c1, %c0_19] : memref<3x64xf32, #tpu.memory_space<vmem>>, vector<1x64xf32>
    %c2 = arith.constant 2 : index
    %c0_20 = arith.constant 0 : index
    %15 = vector.load %arg6[%c2, %c0_20] : memref<3x64xf32, #tpu.memory_space<vmem>>, vector<1x64xf32>
    %c0_21 = arith.constant 0 : index
    %c0_22 = arith.constant 0 : index
    %16 = vector.load %arg7[%c0_21, %c0_22] : memref<11x32xf32, #tpu.memory_space<vmem>>, vector<1x32xf32>
    %c1_23 = arith.constant 1 : index
    %c0_24 = arith.constant 0 : index
    %17 = vector.load %arg7[%c1_23, %c0_24] : memref<11x32xf32, #tpu.memory_space<vmem>>, vector<1x32xf32>
    %c2_25 = arith.constant 2 : index
    %c0_26 = arith.constant 0 : index
    %18 = vector.load %arg7[%c2_25, %c0_26] : memref<11x32xf32, #tpu.memory_space<vmem>>, vector<1x32xf32>
    %c3 = arith.constant 3 : index
    %c0_27 = arith.constant 0 : index
    %19 = vector.load %arg7[%c3, %c0_27] : memref<11x32xf32, #tpu.memory_space<vmem>>, vector<1x32xf32>
    %c4 = arith.constant 4 : index
    %c0_28 = arith.constant 0 : index
    %20 = vector.load %arg7[%c4, %c0_28] : memref<11x32xf32, #tpu.memory_space<vmem>>, vector<1x32xf32>
    %c5 = arith.constant 5 : index
    %c0_29 = arith.constant 0 : index
    %21 = vector.load %arg7[%c5, %c0_29] : memref<11x32xf32, #tpu.memory_space<vmem>>, vector<1x32xf32>
    %c6 = arith.constant 6 : index
    %c0_30 = arith.constant 0 : index
    %22 = vector.load %arg7[%c6, %c0_30] : memref<11x32xf32, #tpu.memory_space<vmem>>, vector<1x32xf32>
    %c7 = arith.constant 7 : index
    %c0_31 = arith.constant 0 : index
    %23 = vector.load %arg7[%c7, %c0_31] : memref<11x32xf32, #tpu.memory_space<vmem>>, vector<1x32xf32>
    %c8 = arith.constant 8 : index
    %c0_32 = arith.constant 0 : index
    %24 = vector.load %arg7[%c8, %c0_32] : memref<11x32xf32, #tpu.memory_space<vmem>>, vector<1x32xf32>
    %c9 = arith.constant 9 : index
    %c0_33 = arith.constant 0 : index
    %25 = vector.load %arg7[%c9, %c0_33] : memref<11x32xf32, #tpu.memory_space<vmem>>, vector<1x32xf32>
    %c10 = arith.constant 10 : index
    %c0_34 = arith.constant 0 : index
    %26 = vector.load %arg7[%c10, %c0_34] : memref<11x32xf32, #tpu.memory_space<vmem>>, vector<1x32xf32>
    %cst = arith.constant dense<0.000000e+00> : vector<16x64xf32>
    %27 = tpu.matmul %4, %7, %cst {dimension_numbers = #tpu.dot_dimension_numbers<[1], [0], [0], [1], [0, 0, 1, 1], [], []>} : vector<16x32xf32>, vector<32x64xf32>, vector<16x64xf32> -> vector<16x64xf32>
    %28 = vector.broadcast %13 : vector<1x64xf32> to vector<16x64xf32>
    %29 = arith.addf %27, %28 : vector<16x64xf32>
    %cst_35 = arith.constant dense<0.000000e+00> : vector<16x64xf32>
    %30 = tpu.matmul %2, %8, %cst_35 {dimension_numbers = #tpu.dot_dimension_numbers<[1], [0], [0], [1], [0, 0, 1, 1], [], []>} : vector<16x32xf32>, vector<32x64xf32>, vector<16x64xf32> -> vector<16x64xf32>
    %31 = vector.broadcast %14 : vector<1x64xf32> to vector<16x64xf32>
    %32 = arith.addf %30, %31 : vector<16x64xf32>
    %33 = vector.extract_strided_slice %29 {offsets = [0, 0], sizes = [16, 32], strides = [1, 1]} : vector<16x64xf32> to vector<16x32xf32>
    %34 = vector.shape_cast %33 : vector<16x32xf32> to vector<2x8x32xf32>
    %35 = vector.extract_strided_slice %29 {offsets = [0, 32], sizes = [16, 32], strides = [1, 1]} : vector<16x64xf32> to vector<16x32xf32>
    %36 = vector.shape_cast %35 : vector<16x32xf32> to vector<2x8x32xf32>
    %37 = vector.extract_strided_slice %32 {offsets = [0, 0], sizes = [16, 32], strides = [1, 1]} : vector<16x64xf32> to vector<16x32xf32>
    %38 = vector.shape_cast %37 : vector<16x32xf32> to vector<2x8x32xf32>
    %39 = vector.extract_strided_slice %32 {offsets = [0, 32], sizes = [16, 32], strides = [1, 1]} : vector<16x64xf32> to vector<16x32xf32>
    %40 = vector.shape_cast %39 : vector<16x32xf32> to vector<2x8x32xf32>
    %41 = arith.addf %0, %1 : vector<16x32xf32>
    %cst_36 = arith.constant dense<0.000000e+00> : vector<16x32xf32>
    %42 = tpu.matmul %41, %5, %cst_36 {dimension_numbers = #tpu.dot_dimension_numbers<[1], [0], [0], [1], [0, 0, 1, 1], [], []>} : vector<16x32xf32>, vector<32x32xf32>, vector<16x32xf32> -> vector<16x32xf32>
    %43 = vector.broadcast %16 : vector<1x32xf32> to vector<16x32xf32>
    %44 = arith.addf %42, %43 : vector<16x32xf32>
    %45 = vector.shape_cast %44 : vector<16x32xf32> to vector<2x8x32xf32>
    %46 = vector.extract_strided_slice %45 {offsets = [0, 0, 0], sizes = [2, 8, 8], strides = [1, 1, 1]} : vector<2x8x32xf32> to vector<2x8x8xf32>
    %47 = vector.extract_strided_slice %34 {offsets = [0, 0, 0], sizes = [2, 8, 8], strides = [1, 1, 1]} : vector<2x8x32xf32> to vector<2x8x8xf32>
    "tpu.trace_start"() <{level = 10 : i32, message = "bqd,bkd->bqk"}> : () -> ()
    %cst_37 = arith.constant dense<0.000000e+00> : vector<2x8x8xf32>
    %48 = tpu.matmul %46, %47, %cst_37 {dimension_numbers = #tpu.dot_dimension_numbers<[2], [2], [1], [1], [0, 0, 0, 1, 1, 1], [0], [0]>} : vector<2x8x8xf32>, vector<2x8x8xf32>, vector<2x8x8xf32> -> vector<2x8x8xf32>
    "tpu.trace_stop"() : () -> ()
    %cst_38 = arith.constant dense<0xFF800000> : vector<2x8xf32>
    %49 = vector.multi_reduction <maximumf>, %48, %cst_38 [2] : vector<2x8x8xf32> to vector<2x8xf32>
    %50 = vector.shape_cast %49 : vector<2x8xf32> to vector<2x8x1xf32>
    %51 = vector.broadcast %50 : vector<2x8x1xf32> to vector<2x8x8xf32>
    %52 = arith.subf %48, %51 : vector<2x8x8xf32>
    %53 = math.exp %52 : vector<2x8x8xf32>
    %cst_39 = arith.constant dense<0.000000e+00> : vector<2x8xf32>
    %54 = vector.multi_reduction <add>, %53, %cst_39 [2] : vector<2x8x8xf32> to vector<2x8xf32>
    %55 = vector.shape_cast %54 : vector<2x8xf32> to vector<2x8x1xf32>
    %56 = tpu.reciprocal %55 {approx = true} : vector<2x8x1xf32> -> vector<2x8x1xf32>
    %57 = vector.broadcast %56 : vector<2x8x1xf32> to vector<2x8x8xf32>
    %58 = arith.mulf %53, %57 : vector<2x8x8xf32>
    %59 = vector.extract_strided_slice %38 {offsets = [0, 0, 0], sizes = [2, 8, 8], strides = [1, 1, 1]} : vector<2x8x32xf32> to vector<2x8x8xf32>
    "tpu.trace_start"() <{level = 10 : i32, message = "bqk,bkd->bqd"}> : () -> ()
    %cst_40 = arith.constant dense<0.000000e+00> : vector<2x8x8xf32>
    %60 = tpu.matmul %58, %59, %cst_40 {dimension_numbers = #tpu.dot_dimension_numbers<[2], [1], [1], [2], [0, 0, 0, 1, 1, 2], [0], [0]>} : vector<2x8x8xf32>, vector<2x8x8xf32>, vector<2x8x8xf32> -> vector<2x8x8xf32>
    "tpu.trace_stop"() : () -> ()
    %61 = vector.extract_strided_slice %45 {offsets = [0, 0, 8], sizes = [2, 8, 8], strides = [1, 1, 1]} : vector<2x8x32xf32> to vector<2x8x8xf32>
    %62 = vector.extract_strided_slice %34 {offsets = [0, 0, 8], sizes = [2, 8, 8], strides = [1, 1, 1]} : vector<2x8x32xf32> to vector<2x8x8xf32>
    "tpu.trace_start"() <{level = 10 : i32, message = "bqd,bkd->bqk"}> : () -> ()
    %cst_41 = arith.constant dense<0.000000e+00> : vector<2x8x8xf32>
    %63 = tpu.matmul %61, %62, %cst_41 {dimension_numbers = #tpu.dot_dimension_numbers<[2], [2], [1], [1], [0, 0, 0, 1, 1, 1], [0], [0]>} : vector<2x8x8xf32>, vector<2x8x8xf32>, vector<2x8x8xf32> -> vector<2x8x8xf32>
    "tpu.trace_stop"() : () -> ()
    %cst_42 = arith.constant dense<0xFF800000> : vector<2x8xf32>
    %64 = vector.multi_reduction <maximumf>, %63, %cst_42 [2] : vector<2x8x8xf32> to vector<2x8xf32>
    %65 = vector.shape_cast %64 : vector<2x8xf32> to vector<2x8x1xf32>
    %66 = vector.broadcast %65 : vector<2x8x1xf32> to vector<2x8x8xf32>
    %67 = arith.subf %63, %66 : vector<2x8x8xf32>
    %68 = math.exp %67 : vector<2x8x8xf32>
    %cst_43 = arith.constant dense<0.000000e+00> : vector<2x8xf32>
    %69 = vector.multi_reduction <add>, %68, %cst_43 [2] : vector<2x8x8xf32> to vector<2x8xf32>
    %70 = vector.shape_cast %69 : vector<2x8xf32> to vector<2x8x1xf32>
    %71 = tpu.reciprocal %70 {approx = true} : vector<2x8x1xf32> -> vector<2x8x1xf32>
    %72 = vector.broadcast %71 : vector<2x8x1xf32> to vector<2x8x8xf32>
    %73 = arith.mulf %68, %72 : vector<2x8x8xf32>
    %74 = vector.extract_strided_slice %38 {offsets = [0, 0, 8], sizes = [2, 8, 8], strides = [1, 1, 1]} : vector<2x8x32xf32> to vector<2x8x8xf32>
    "tpu.trace_start"() <{level = 10 : i32, message = "bqk,bkd->bqd"}> : () -> ()
    %cst_44 = arith.constant dense<0.000000e+00> : vector<2x8x8xf32>
    %75 = tpu.matmul %73, %74, %cst_44 {dimension_numbers = #tpu.dot_dimension_numbers<[2], [1], [1], [2], [0, 0, 0, 1, 1, 2], [0], [0]>} : vector<2x8x8xf32>, vector<2x8x8xf32>, vector<2x8x8xf32> -> vector<2x8x8xf32>
    "tpu.trace_stop"() : () -> ()
    %76 = vector.extract_strided_slice %45 {offsets = [0, 0, 16], sizes = [2, 8, 8], strides = [1, 1, 1]} : vector<2x8x32xf32> to vector<2x8x8xf32>
    %77 = vector.extract_strided_slice %34 {offsets = [0, 0, 16], sizes = [2, 8, 8], strides = [1, 1, 1]} : vector<2x8x32xf32> to vector<2x8x8xf32>
    "tpu.trace_start"() <{level = 10 : i32, message = "bqd,bkd->bqk"}> : () -> ()
    %cst_45 = arith.constant dense<0.000000e+00> : vector<2x8x8xf32>
    %78 = tpu.matmul %76, %77, %cst_45 {dimension_numbers = #tpu.dot_dimension_numbers<[2], [2], [1], [1], [0, 0, 0, 1, 1, 1], [0], [0]>} : vector<2x8x8xf32>, vector<2x8x8xf32>, vector<2x8x8xf32> -> vector<2x8x8xf32>
    "tpu.trace_stop"() : () -> ()
    %cst_46 = arith.constant dense<0xFF800000> : vector<2x8xf32>
    %79 = vector.multi_reduction <maximumf>, %78, %cst_46 [2] : vector<2x8x8xf32> to vector<2x8xf32>
    %80 = vector.shape_cast %79 : vector<2x8xf32> to vector<2x8x1xf32>
    %81 = vector.broadcast %80 : vector<2x8x1xf32> to vector<2x8x8xf32>
    %82 = arith.subf %78, %81 : vector<2x8x8xf32>
    %83 = math.exp %82 : vector<2x8x8xf32>
    %cst_47 = arith.constant dense<0.000000e+00> : vector<2x8xf32>
    %84 = vector.multi_reduction <add>, %83, %cst_47 [2] : vector<2x8x8xf32> to vector<2x8xf32>
    %85 = vector.shape_cast %84 : vector<2x8xf32> to vector<2x8x1xf32>
    %86 = tpu.reciprocal %85 {approx = true} : vector<2x8x1xf32> -> vector<2x8x1xf32>
    %87 = vector.broadcast %86 : vector<2x8x1xf32> to vector<2x8x8xf32>
    %88 = arith.mulf %83, %87 : vector<2x8x8xf32>
    %89 = vector.extract_strided_slice %38 {offsets = [0, 0, 16], sizes = [2, 8, 8], strides = [1, 1, 1]} : vector<2x8x32xf32> to vector<2x8x8xf32>
    "tpu.trace_start"() <{level = 10 : i32, message = "bqk,bkd->bqd"}> : () -> ()
    %cst_48 = arith.constant dense<0.000000e+00> : vector<2x8x8xf32>
    %90 = tpu.matmul %88, %89, %cst_48 {dimension_numbers = #tpu.dot_dimension_numbers<[2], [1], [1], [2], [0, 0, 0, 1, 1, 2], [0], [0]>} : vector<2x8x8xf32>, vector<2x8x8xf32>, vector<2x8x8xf32> -> vector<2x8x8xf32>
    "tpu.trace_stop"() : () -> ()
    %91 = vector.extract_strided_slice %45 {offsets = [0, 0, 24], sizes = [2, 8, 8], strides = [1, 1, 1]} : vector<2x8x32xf32> to vector<2x8x8xf32>
    %92 = vector.extract_strided_slice %34 {offsets = [0, 0, 24], sizes = [2, 8, 8], strides = [1, 1, 1]} : vector<2x8x32xf32> to vector<2x8x8xf32>
    "tpu.trace_start"() <{level = 10 : i32, message = "bqd,bkd->bqk"}> : () -> ()
    %cst_49 = arith.constant dense<0.000000e+00> : vector<2x8x8xf32>
    %93 = tpu.matmul %91, %92, %cst_49 {dimension_numbers = #tpu.dot_dimension_numbers<[2], [2], [1], [1], [0, 0, 0, 1, 1, 1], [0], [0]>} : vector<2x8x8xf32>, vector<2x8x8xf32>, vector<2x8x8xf32> -> vector<2x8x8xf32>
    "tpu.trace_stop"() : () -> ()
    %cst_50 = arith.constant dense<0xFF800000> : vector<2x8xf32>
    %94 = vector.multi_reduction <maximumf>, %93, %cst_50 [2] : vector<2x8x8xf32> to vector<2x8xf32>
    %95 = vector.shape_cast %94 : vector<2x8xf32> to vector<2x8x1xf32>
    %96 = vector.broadcast %95 : vector<2x8x1xf32> to vector<2x8x8xf32>
    %97 = arith.subf %93, %96 : vector<2x8x8xf32>
    %98 = math.exp %97 : vector<2x8x8xf32>
    %cst_51 = arith.constant dense<0.000000e+00> : vector<2x8xf32>
    %99 = vector.multi_reduction <add>, %98, %cst_51 [2] : vector<2x8x8xf32> to vector<2x8xf32>
    %100 = vector.shape_cast %99 : vector<2x8xf32> to vector<2x8x1xf32>
    %101 = tpu.reciprocal %100 {approx = true} : vector<2x8x1xf32> -> vector<2x8x1xf32>
    %102 = vector.broadcast %101 : vector<2x8x1xf32> to vector<2x8x8xf32>
    %103 = arith.mulf %98, %102 : vector<2x8x8xf32>
    %104 = vector.extract_strided_slice %38 {offsets = [0, 0, 24], sizes = [2, 8, 8], strides = [1, 1, 1]} : vector<2x8x32xf32> to vector<2x8x8xf32>
    "tpu.trace_start"() <{level = 10 : i32, message = "bqk,bkd->bqd"}> : () -> ()
    %cst_52 = arith.constant dense<0.000000e+00> : vector<2x8x8xf32>
    %105 = tpu.matmul %103, %104, %cst_52 {dimension_numbers = #tpu.dot_dimension_numbers<[2], [1], [1], [2], [0, 0, 0, 1, 1, 2], [0], [0]>} : vector<2x8x8xf32>, vector<2x8x8xf32>, vector<2x8x8xf32> -> vector<2x8x8xf32>
    "tpu.trace_stop"() : () -> ()
    %106 = tpu.concatenate %60, %75, %90, %105 in 2 : vector<2x8x8xf32>, vector<2x8x8xf32>, vector<2x8x8xf32>, vector<2x8x8xf32> -> vector<2x8x32xf32>
    %107 = vector.shape_cast %106 : vector<2x8x32xf32> to vector<16x32xf32>
    %cst_53 = arith.constant dense<0.000000e+00> : vector<16x32xf32>
    %108 = tpu.matmul %107, %9, %cst_53 {dimension_numbers = #tpu.dot_dimension_numbers<[1], [0], [0], [1], [0, 0, 1, 1], [], []>} : vector<16x32xf32>, vector<32x32xf32>, vector<16x32xf32> -> vector<16x32xf32>
    %109 = vector.broadcast %18 : vector<1x32xf32> to vector<16x32xf32>
    %110 = arith.addf %108, %109 : vector<16x32xf32>
    %111 = arith.addf %0, %110 : vector<16x32xf32>
    %cst_54 = arith.constant dense<0.000000e+00> : vector<16xf32>
    %112 = vector.multi_reduction <add>, %111, %cst_54 [1] : vector<16x32xf32> to vector<16xf32>
    %113 = vector.shape_cast %112 : vector<16xf32> to vector<16x1xf32>
    %cst_55 = arith.constant 3.200000e+01 : f32
    %114 = vector.broadcast %cst_55 : f32 to vector<16x1xf32>
    %115 = arith.divf %113, %114 : vector<16x1xf32>
    %116 = vector.broadcast %115 : vector<16x1xf32> to vector<16x32xf32>
    %117 = arith.subf %111, %116 : vector<16x32xf32>
    %118 = arith.mulf %117, %117 : vector<16x32xf32>
    %cst_56 = arith.constant dense<0.000000e+00> : vector<16xf32>
    %119 = vector.multi_reduction <add>, %118, %cst_56 [1] : vector<16x32xf32> to vector<16xf32>
    %120 = vector.shape_cast %119 : vector<16xf32> to vector<16x1xf32>
    %cst_57 = arith.constant 3.200000e+01 : f32
    %121 = vector.broadcast %cst_57 : f32 to vector<16x1xf32>
    %122 = arith.divf %120, %121 : vector<16x1xf32>
    %123 = vector.broadcast %115 : vector<16x1xf32> to vector<16x32xf32>
    %124 = arith.subf %111, %123 : vector<16x32xf32>
    %cst_58 = arith.constant 9.99999974E-6 : f32
    %125 = vector.broadcast %cst_58 : f32 to vector<16x1xf32>
    %126 = arith.addf %122, %125 : vector<16x1xf32>
    %127 = math.rsqrt %126 : vector<16x1xf32>
    %128 = vector.broadcast %127 : vector<16x1xf32> to vector<16x32xf32>
    %129 = arith.mulf %124, %128 : vector<16x32xf32>
    %130 = vector.broadcast %21 : vector<1x32xf32> to vector<16x32xf32>
    %131 = arith.mulf %129, %130 : vector<16x32xf32>
    %132 = vector.broadcast %22 : vector<1x32xf32> to vector<16x32xf32>
    %133 = arith.addf %131, %132 : vector<16x32xf32>
    %134 = arith.addf %133, %1 : vector<16x32xf32>
    %cst_59 = arith.constant dense<0.000000e+00> : vector<16x32xf32>
    %135 = tpu.matmul %134, %6, %cst_59 {dimension_numbers = #tpu.dot_dimension_numbers<[1], [0], [0], [1], [0, 0, 1, 1], [], []>} : vector<16x32xf32>, vector<32x32xf32>, vector<16x32xf32> -> vector<16x32xf32>
    %136 = vector.broadcast %17 : vector<1x32xf32> to vector<16x32xf32>
    %137 = arith.addf %135, %136 : vector<16x32xf32>
    %138 = vector.shape_cast %137 : vector<16x32xf32> to vector<2x8x32xf32>
    %139 = vector.extract_strided_slice %138 {offsets = [0, 0, 0], sizes = [2, 8, 8], strides = [1, 1, 1]} : vector<2x8x32xf32> to vector<2x8x8xf32>
    %140 = vector.extract_strided_slice %36 {offsets = [0, 0, 0], sizes = [2, 8, 8], strides = [1, 1, 1]} : vector<2x8x32xf32> to vector<2x8x8xf32>
    "tpu.trace_start"() <{level = 10 : i32, message = "bqd,bkd->bqk"}> : () -> ()
    %cst_60 = arith.constant dense<0.000000e+00> : vector<2x8x8xf32>
    %141 = tpu.matmul %139, %140, %cst_60 {dimension_numbers = #tpu.dot_dimension_numbers<[2], [2], [1], [1], [0, 0, 0, 1, 1, 1], [0], [0]>} : vector<2x8x8xf32>, vector<2x8x8xf32>, vector<2x8x8xf32> -> vector<2x8x8xf32>
    "tpu.trace_stop"() : () -> ()
    %cst_61 = arith.constant dense<0xFF800000> : vector<2x8xf32>
    %142 = vector.multi_reduction <maximumf>, %141, %cst_61 [2] : vector<2x8x8xf32> to vector<2x8xf32>
    %143 = vector.shape_cast %142 : vector<2x8xf32> to vector<2x8x1xf32>
    %144 = vector.broadcast %143 : vector<2x8x1xf32> to vector<2x8x8xf32>
    %145 = arith.subf %141, %144 : vector<2x8x8xf32>
    %146 = math.exp %145 : vector<2x8x8xf32>
    %cst_62 = arith.constant dense<0.000000e+00> : vector<2x8xf32>
    %147 = vector.multi_reduction <add>, %146, %cst_62 [2] : vector<2x8x8xf32> to vector<2x8xf32>
    %148 = vector.shape_cast %147 : vector<2x8xf32> to vector<2x8x1xf32>
    %149 = tpu.reciprocal %148 {approx = true} : vector<2x8x1xf32> -> vector<2x8x1xf32>
    %150 = vector.broadcast %149 : vector<2x8x1xf32> to vector<2x8x8xf32>
    %151 = arith.mulf %146, %150 : vector<2x8x8xf32>
    %152 = vector.extract_strided_slice %40 {offsets = [0, 0, 0], sizes = [2, 8, 8], strides = [1, 1, 1]} : vector<2x8x32xf32> to vector<2x8x8xf32>
    "tpu.trace_start"() <{level = 10 : i32, message = "bqk,bkd->bqd"}> : () -> ()
    %cst_63 = arith.constant dense<0.000000e+00> : vector<2x8x8xf32>
    %153 = tpu.matmul %151, %152, %cst_63 {dimension_numbers = #tpu.dot_dimension_numbers<[2], [1], [1], [2], [0, 0, 0, 1, 1, 2], [0], [0]>} : vector<2x8x8xf32>, vector<2x8x8xf32>, vector<2x8x8xf32> -> vector<2x8x8xf32>
    "tpu.trace_stop"() : () -> ()
    %154 = vector.extract_strided_slice %138 {offsets = [0, 0, 8], sizes = [2, 8, 8], strides = [1, 1, 1]} : vector<2x8x32xf32> to vector<2x8x8xf32>
    %155 = vector.extract_strided_slice %36 {offsets = [0, 0, 8], sizes = [2, 8, 8], strides = [1, 1, 1]} : vector<2x8x32xf32> to vector<2x8x8xf32>
    "tpu.trace_start"() <{level = 10 : i32, message = "bqd,bkd->bqk"}> : () -> ()
    %cst_64 = arith.constant dense<0.000000e+00> : vector<2x8x8xf32>
    %156 = tpu.matmul %154, %155, %cst_64 {dimension_numbers = #tpu.dot_dimension_numbers<[2], [2], [1], [1], [0, 0, 0, 1, 1, 1], [0], [0]>} : vector<2x8x8xf32>, vector<2x8x8xf32>, vector<2x8x8xf32> -> vector<2x8x8xf32>
    "tpu.trace_stop"() : () -> ()
    %cst_65 = arith.constant dense<0xFF800000> : vector<2x8xf32>
    %157 = vector.multi_reduction <maximumf>, %156, %cst_65 [2] : vector<2x8x8xf32> to vector<2x8xf32>
    %158 = vector.shape_cast %157 : vector<2x8xf32> to vector<2x8x1xf32>
    %159 = vector.broadcast %158 : vector<2x8x1xf32> to vector<2x8x8xf32>
    %160 = arith.subf %156, %159 : vector<2x8x8xf32>
    %161 = math.exp %160 : vector<2x8x8xf32>
    %cst_66 = arith.constant dense<0.000000e+00> : vector<2x8xf32>
    %162 = vector.multi_reduction <add>, %161, %cst_66 [2] : vector<2x8x8xf32> to vector<2x8xf32>
    %163 = vector.shape_cast %162 : vector<2x8xf32> to vector<2x8x1xf32>
    %164 = tpu.reciprocal %163 {approx = true} : vector<2x8x1xf32> -> vector<2x8x1xf32>
    %165 = vector.broadcast %164 : vector<2x8x1xf32> to vector<2x8x8xf32>
    %166 = arith.mulf %161, %165 : vector<2x8x8xf32>
    %167 = vector.extract_strided_slice %40 {offsets = [0, 0, 8], sizes = [2, 8, 8], strides = [1, 1, 1]} : vector<2x8x32xf32> to vector<2x8x8xf32>
    "tpu.trace_start"() <{level = 10 : i32, message = "bqk,bkd->bqd"}> : () -> ()
    %cst_67 = arith.constant dense<0.000000e+00> : vector<2x8x8xf32>
    %168 = tpu.matmul %166, %167, %cst_67 {dimension_numbers = #tpu.dot_dimension_numbers<[2], [1], [1], [2], [0, 0, 0, 1, 1, 2], [0], [0]>} : vector<2x8x8xf32>, vector<2x8x8xf32>, vector<2x8x8xf32> -> vector<2x8x8xf32>
    "tpu.trace_stop"() : () -> ()
    %169 = vector.extract_strided_slice %138 {offsets = [0, 0, 16], sizes = [2, 8, 8], strides = [1, 1, 1]} : vector<2x8x32xf32> to vector<2x8x8xf32>
    %170 = vector.extract_strided_slice %36 {offsets = [0, 0, 16], sizes = [2, 8, 8], strides = [1, 1, 1]} : vector<2x8x32xf32> to vector<2x8x8xf32>
    "tpu.trace_start"() <{level = 10 : i32, message = "bqd,bkd->bqk"}> : () -> ()
    %cst_68 = arith.constant dense<0.000000e+00> : vector<2x8x8xf32>
    %171 = tpu.matmul %169, %170, %cst_68 {dimension_numbers = #tpu.dot_dimension_numbers<[2], [2], [1], [1], [0, 0, 0, 1, 1, 1], [0], [0]>} : vector<2x8x8xf32>, vector<2x8x8xf32>, vector<2x8x8xf32> -> vector<2x8x8xf32>
    "tpu.trace_stop"() : () -> ()
    %cst_69 = arith.constant dense<0xFF800000> : vector<2x8xf32>
    %172 = vector.multi_reduction <maximumf>, %171, %cst_69 [2] : vector<2x8x8xf32> to vector<2x8xf32>
    %173 = vector.shape_cast %172 : vector<2x8xf32> to vector<2x8x1xf32>
    %174 = vector.broadcast %173 : vector<2x8x1xf32> to vector<2x8x8xf32>
    %175 = arith.subf %171, %174 : vector<2x8x8xf32>
    %176 = math.exp %175 : vector<2x8x8xf32>
    %cst_70 = arith.constant dense<0.000000e+00> : vector<2x8xf32>
    %177 = vector.multi_reduction <add>, %176, %cst_70 [2] : vector<2x8x8xf32> to vector<2x8xf32>
    %178 = vector.shape_cast %177 : vector<2x8xf32> to vector<2x8x1xf32>
    %179 = tpu.reciprocal %178 {approx = true} : vector<2x8x1xf32> -> vector<2x8x1xf32>
    %180 = vector.broadcast %179 : vector<2x8x1xf32> to vector<2x8x8xf32>
    %181 = arith.mulf %176, %180 : vector<2x8x8xf32>
    %182 = vector.extract_strided_slice %40 {offsets = [0, 0, 16], sizes = [2, 8, 8], strides = [1, 1, 1]} : vector<2x8x32xf32> to vector<2x8x8xf32>
    "tpu.trace_start"() <{level = 10 : i32, message = "bqk,bkd->bqd"}> : () -> ()
    %cst_71 = arith.constant dense<0.000000e+00> : vector<2x8x8xf32>
    %183 = tpu.matmul %181, %182, %cst_71 {dimension_numbers = #tpu.dot_dimension_numbers<[2], [1], [1], [2], [0, 0, 0, 1, 1, 2], [0], [0]>} : vector<2x8x8xf32>, vector<2x8x8xf32>, vector<2x8x8xf32> -> vector<2x8x8xf32>
    "tpu.trace_stop"() : () -> ()
    %184 = vector.extract_strided_slice %138 {offsets = [0, 0, 24], sizes = [2, 8, 8], strides = [1, 1, 1]} : vector<2x8x32xf32> to vector<2x8x8xf32>
    %185 = vector.extract_strided_slice %36 {offsets = [0, 0, 24], sizes = [2, 8, 8], strides = [1, 1, 1]} : vector<2x8x32xf32> to vector<2x8x8xf32>
    "tpu.trace_start"() <{level = 10 : i32, message = "bqd,bkd->bqk"}> : () -> ()
    %cst_72 = arith.constant dense<0.000000e+00> : vector<2x8x8xf32>
    %186 = tpu.matmul %184, %185, %cst_72 {dimension_numbers = #tpu.dot_dimension_numbers<[2], [2], [1], [1], [0, 0, 0, 1, 1, 1], [0], [0]>} : vector<2x8x8xf32>, vector<2x8x8xf32>, vector<2x8x8xf32> -> vector<2x8x8xf32>
    "tpu.trace_stop"() : () -> ()
    %cst_73 = arith.constant dense<0xFF800000> : vector<2x8xf32>
    %187 = vector.multi_reduction <maximumf>, %186, %cst_73 [2] : vector<2x8x8xf32> to vector<2x8xf32>
    %188 = vector.shape_cast %187 : vector<2x8xf32> to vector<2x8x1xf32>
    %189 = vector.broadcast %188 : vector<2x8x1xf32> to vector<2x8x8xf32>
    %190 = arith.subf %186, %189 : vector<2x8x8xf32>
    %191 = math.exp %190 : vector<2x8x8xf32>
    %cst_74 = arith.constant dense<0.000000e+00> : vector<2x8xf32>
    %192 = vector.multi_reduction <add>, %191, %cst_74 [2] : vector<2x8x8xf32> to vector<2x8xf32>
    %193 = vector.shape_cast %192 : vector<2x8xf32> to vector<2x8x1xf32>
    %194 = tpu.reciprocal %193 {approx = true} : vector<2x8x1xf32> -> vector<2x8x1xf32>
    %195 = vector.broadcast %194 : vector<2x8x1xf32> to vector<2x8x8xf32>
    %196 = arith.mulf %191, %195 : vector<2x8x8xf32>
    %197 = vector.extract_strided_slice %40 {offsets = [0, 0, 24], sizes = [2, 8, 8], strides = [1, 1, 1]} : vector<2x8x32xf32> to vector<2x8x8xf32>
    "tpu.trace_start"() <{level = 10 : i32, message = "bqk,bkd->bqd"}> : () -> ()
    %cst_75 = arith.constant dense<0.000000e+00> : vector<2x8x8xf32>
    %198 = tpu.matmul %196, %197, %cst_75 {dimension_numbers = #tpu.dot_dimension_numbers<[2], [1], [1], [2], [0, 0, 0, 1, 1, 2], [0], [0]>} : vector<2x8x8xf32>, vector<2x8x8xf32>, vector<2x8x8xf32> -> vector<2x8x8xf32>
    "tpu.trace_stop"() : () -> ()
    %199 = tpu.concatenate %153, %168, %183, %198 in 2 : vector<2x8x8xf32>, vector<2x8x8xf32>, vector<2x8x8xf32>, vector<2x8x8xf32> -> vector<2x8x32xf32>
    %200 = vector.shape_cast %199 : vector<2x8x32xf32> to vector<16x32xf32>
    %cst_76 = arith.constant dense<0.000000e+00> : vector<16x32xf32>
    %201 = tpu.matmul %200, %10, %cst_76 {dimension_numbers = #tpu.dot_dimension_numbers<[1], [0], [0], [1], [0, 0, 1, 1], [], []>} : vector<16x32xf32>, vector<32x32xf32>, vector<16x32xf32> -> vector<16x32xf32>
    %202 = vector.broadcast %19 : vector<1x32xf32> to vector<16x32xf32>
    %203 = arith.addf %201, %202 : vector<16x32xf32>
    %204 = arith.addf %133, %203 : vector<16x32xf32>
    %cst_77 = arith.constant dense<0.000000e+00> : vector<16xf32>
    %205 = vector.multi_reduction <add>, %204, %cst_77 [1] : vector<16x32xf32> to vector<16xf32>
    %206 = vector.shape_cast %205 : vector<16xf32> to vector<16x1xf32>
    %cst_78 = arith.constant 3.200000e+01 : f32
    %207 = vector.broadcast %cst_78 : f32 to vector<16x1xf32>
    %208 = arith.divf %206, %207 : vector<16x1xf32>
    %209 = vector.broadcast %208 : vector<16x1xf32> to vector<16x32xf32>
    %210 = arith.subf %204, %209 : vector<16x32xf32>
    %211 = arith.mulf %210, %210 : vector<16x32xf32>
    %cst_79 = arith.constant dense<0.000000e+00> : vector<16xf32>
    %212 = vector.multi_reduction <add>, %211, %cst_79 [1] : vector<16x32xf32> to vector<16xf32>
    %213 = vector.shape_cast %212 : vector<16xf32> to vector<16x1xf32>
    %cst_80 = arith.constant 3.200000e+01 : f32
    %214 = vector.broadcast %cst_80 : f32 to vector<16x1xf32>
    %215 = arith.divf %213, %214 : vector<16x1xf32>
    %216 = vector.broadcast %208 : vector<16x1xf32> to vector<16x32xf32>
    %217 = arith.subf %204, %216 : vector<16x32xf32>
    %cst_81 = arith.constant 9.99999974E-6 : f32
    %218 = vector.broadcast %cst_81 : f32 to vector<16x1xf32>
    %219 = arith.addf %215, %218 : vector<16x1xf32>
    %220 = math.rsqrt %219 : vector<16x1xf32>
    %221 = vector.broadcast %220 : vector<16x1xf32> to vector<16x32xf32>
    %222 = arith.mulf %217, %221 : vector<16x32xf32>
    %223 = vector.broadcast %23 : vector<1x32xf32> to vector<16x32xf32>
    %224 = arith.mulf %222, %223 : vector<16x32xf32>
    %225 = vector.broadcast %24 : vector<1x32xf32> to vector<16x32xf32>
    %226 = arith.addf %224, %225 : vector<16x32xf32>
    %cst_82 = arith.constant dense<0.000000e+00> : vector<16x64xf32>
    %227 = tpu.matmul %226, %11, %cst_82 {dimension_numbers = #tpu.dot_dimension_numbers<[1], [0], [0], [1], [0, 0, 1, 1], [], []>} : vector<16x32xf32>, vector<32x64xf32>, vector<16x64xf32> -> vector<16x64xf32>
    %228 = vector.broadcast %15 : vector<1x64xf32> to vector<16x64xf32>
    %229 = arith.addf %227, %228 : vector<16x64xf32>
    %cst_83 = arith.constant 0.000000e+00 : f32
    %230 = vector.broadcast %cst_83 : f32 to vector<16x64xf32>
    %231 = arith.maximumf %229, %230 : vector<16x64xf32>
    %cst_84 = arith.constant dense<0.000000e+00> : vector<16x32xf32>
    %232 = tpu.matmul %231, %12, %cst_84 {dimension_numbers = #tpu.dot_dimension_numbers<[1], [0], [0], [1], [0, 0, 1, 1], [], []>} : vector<16x64xf32>, vector<64x32xf32>, vector<16x32xf32> -> vector<16x32xf32>
    %233 = vector.broadcast %20 : vector<1x32xf32> to vector<16x32xf32>
    %234 = arith.addf %232, %233 : vector<16x32xf32>
    %235 = arith.addf %226, %234 : vector<16x32xf32>
    %cst_85 = arith.constant dense<0.000000e+00> : vector<16xf32>
    %236 = vector.multi_reduction <add>, %235, %cst_85 [1] : vector<16x32xf32> to vector<16xf32>
    %237 = vector.shape_cast %236 : vector<16xf32> to vector<16x1xf32>
    %cst_86 = arith.constant 3.200000e+01 : f32
    %238 = vector.broadcast %cst_86 : f32 to vector<16x1xf32>
    %239 = arith.divf %237, %238 : vector<16x1xf32>
    %240 = vector.broadcast %239 : vector<16x1xf32> to vector<16x32xf32>
    %241 = arith.subf %235, %240 : vector<16x32xf32>
    %242 = arith.mulf %241, %241 : vector<16x32xf32>
    %cst_87 = arith.constant dense<0.000000e+00> : vector<16xf32>
    %243 = vector.multi_reduction <add>, %242, %cst_87 [1] : vector<16x32xf32> to vector<16xf32>
    %244 = vector.shape_cast %243 : vector<16xf32> to vector<16x1xf32>
    %cst_88 = arith.constant 3.200000e+01 : f32
    %245 = vector.broadcast %cst_88 : f32 to vector<16x1xf32>
    %246 = arith.divf %244, %245 : vector<16x1xf32>
    %247 = vector.broadcast %239 : vector<16x1xf32> to vector<16x32xf32>
    %248 = arith.subf %235, %247 : vector<16x32xf32>
    %cst_89 = arith.constant 9.99999974E-6 : f32
    %249 = vector.broadcast %cst_89 : f32 to vector<16x1xf32>
    %250 = arith.addf %246, %249 : vector<16x1xf32>
    %251 = math.rsqrt %250 : vector<16x1xf32>
    %252 = vector.broadcast %251 : vector<16x1xf32> to vector<16x32xf32>
    %253 = arith.mulf %248, %252 : vector<16x32xf32>
    %254 = vector.broadcast %25 : vector<1x32xf32> to vector<16x32xf32>
    %255 = arith.mulf %253, %254 : vector<16x32xf32>
    %256 = vector.broadcast %26 : vector<1x32xf32> to vector<16x32xf32>
    %257 = arith.addf %255, %256 : vector<16x32xf32>
    %c0_90 = arith.constant 0 : index
    %c0_91 = arith.constant 0 : index
    %258 = vector.load %arg8[%c0_90, %c0_91] : memref<16x32xf32, #tpu.memory_space<vmem>>, vector<16x32xf32>
    tpu.vector_store %arg8[%c0_90, %c0_91], %257 {strides = array<i32>} : memref<16x32xf32, #tpu.memory_space<vmem>>, vector<16x32xf32>,
    return
  }
}

</mosaic_0001>

<bundles_post_ra>
// kernel: tpu_custom_call.1
= control target key start
LH: loop header
LB: loop body
LE: loop exit
PB: predicated region body
PF: predicated region fallthrough
CT: control target
= control target key end

     0   :  { %13 = vsyncpa [#allocation3], 0  ;;  %s2599_s0 = inlined_call_operand.hbm [shape: f32[16,32], index: 0, kind: input, shape index: {}]   ;;  %s2600_s1 = inlined_call_operand.hbm [shape: f32[16,32], index: 1, kind: input, shape index: {}]   ;;  %s2601_s2 = inlined_call_operand.hbm [shape: f32[16,32], index: 2, kind: input, shape index: {}]   ;;  %s2602_s3 = inlined_call_operand.hbm [shape: f32[16,32], index: 3, kind: input, shape index: {}]   ;;  %s2603_s4 = inlined_call_operand.vmem [shape: f32[32,320], index: 4, kind: input, shape index: {}]   ;;  %s2604_s5 = inlined_call_operand.vmem [shape: f32[64,32], index: 5, kind: input, shape index: {}]   ;;  %s2605_s6 = inlined_call_operand.vmem [shape: f32[3,64], index: 6, kind: input, shape index: {}]   ;;  %s2606_s7 = inlined_call_operand.hbm [shape: f32[11,32], index: 7, kind: input, shape index: {}]   ;;  %s2607_s8 = inlined_call_operand.hbm [shape: f32[16,32], index: 8, kind: output, shape index: {}]  }
   0x1   :  { %14 = vsyncpa [#allocation6], 0 }
   0x2   :  { %15 = vsyncpa [#allocation9], 0 }
   0x3   :  { %16 = vsyncpa [#allocation4], 0  ;;  %s34_s29 = sshll.u32 %s2600_s1, 4  ;;  %s2121_s30 = smov [#allocation5]   ;;  %s35_s29 = int_to_ptr.hbm [resolvable:$true] %s34_s29 }
   0x4   :  { %s36_s9 = sshll.u32 %s2121_s30, 4  ;;  %s60_s12 = sshll.u32 %s2602_s3, 4  ;;  %s37_s9 = int_to_ptr.vmem [resolvable:$true] %s36_s9  ;;  %s61_s12 = int_to_ptr.hbm [resolvable:$true] %s60_s12 }
   0x5   :  { %s2122_s13 = smov 128   ;;  %s2123_s14 = smov 8  }
   0x6   :  { %42 = dma.hbm_to_vmem [thread:$0]  %s35_s29, 256, %s37_s9, [#allocation6], %s2122_s13, %s2122_s13, %s2123_s14  }
   0x7   :  { %s2124_s15 = smov [#allocation8]   ;;  %s21_s1 = sshll.u32 %s2599_s0, 4  ;;  %s22_s1 = int_to_ptr.hbm [resolvable:$true] %s21_s1 }
   0x8   :  { %s62_s16 = sshll.u32 %s2124_s15, 4  ;;  %s47_s20 = sshll.u32 %s2601_s2, 4  ;;  %s63_s16 = int_to_ptr.vmem [resolvable:$true] %s62_s16  ;;  %s48_s20 = int_to_ptr.hbm [resolvable:$true] %s47_s20 }
   0x9   :  { %68 = dma.hbm_to_vmem [thread:$0]  %s61_s12, 256, %s63_s16, [#allocation9], %s2122_s13, %s2122_s13, %s2123_s14  }
   0xa   :  { %s2125_s21 = smov [#allocation2]   ;;  %s2126_s23 = smov [#allocation7]  }
   0xb   :  { %s23_s22 = sshll.u32 %s2125_s21, 4  ;;  %s49_s0 = sshll.u32 %s2126_s23, 4  ;;  %s24_s22 = int_to_ptr.vmem [resolvable:$true] %s23_s22  ;;  %s50_s0 = int_to_ptr.vmem [resolvable:$true] %s49_s0 }
   0xc   :  { %29 = dma.hbm_to_vmem [thread:$0]  %s22_s1, 256, %s24_s22, [#allocation3], %s2122_s13, %s2122_s13, %s2123_s14  }
   0xd   :  { %s79_s26 = sshll.u32 %s2606_s7, 4  ;;  %s2127_s2 = smov [#allocation10]   ;;  %s80_s26 = int_to_ptr.hbm [resolvable:$true] %s79_s26 }
   0xe   :  { %55 = dma.hbm_to_vmem [thread:$0]  %s48_s20, 256, %s50_s0, [#allocation6], %s2122_s13, %s2122_s13, %s2123_s14  }
   0xf   :  { %s81_s27 = sshll.u32 %s2127_s2, 4  ;;  %s82_s27 = int_to_ptr.vmem [resolvable:$true] %s81_s27 }
  0x10   :  { %87 = dma.hbm_to_vmem [thread:$0]  %s80_s26, 256, %s82_s27, [#allocation9], %s2122_s13, %s2122_s13, %s2123_s14  }
  0x11   :  { %2113 = dma.done.wait [#allocation3], 256  }
  0x12   :  { %2114 = vsyncadd [#allocation3], 4294967040 }
  0x13   :  { %2115 = dma.done.wait [#allocation6], 512  }
  0x14   :  { %2116 = vsyncadd [#allocation6], 4294966784 }
  0x15   :  { %2117 = dma.done.wait [#allocation9], 512  }
  0x16   :  { %2118 = vsyncadd [#allocation9], 4294966784  ;;  %v120_v0 = vld [vmem:[%s2603_s4 + $0x30] sm:$0xff]  ;;  %v121_v1 = vld [vmem:[%s2603_s4 + $0x48] sm:$0xff]  ;;  %vm169_vm0 = vcmask 261120   ;;  %s2128_s15 = smov 64  }
  0x17   :  { %v2222_v2 = vpack.i.bf16 %v120_v0, %v121_v1  ;;  %250 = vmatpush.msra.mxu2 %v121_v1  ;;  %v2224_v3 = vld [vmem:[#allocation2] sm:$0xff]  ;;  %v119_v6 = vld [vmem:[%s2603_s4 + $0x18] sm:$0xff]  ;;  %v2243_v9 = vld [vmem:[#allocation2 + $0x8] sm:$0xff]  ;;  %s2129_s16 = smov 120   ;;  %vm261_vm1 = vcmask 64512   ;;  %s2130_s1 = smov 112  }
  0x18   :  { %v2226_v4 = vld [vmem:[#allocation7] sm:$0xff]  ;;  %v2245_v10 = vld [vmem:[#allocation7 + $0x8] sm:$0xff]  ;;  %v112_v15 = vld [vmem:[#allocation5] sm:$0xff]  ;;  %s2131_s3 = smov 104   ;;  %s2132_s27 = smov 16   ;;  %vm800_vm2 = vcmask 130048  }
  0x19   :  { %v118_v5 = vld [vmem:[%s2603_s4] sm:$0xff]  ;;  %1820 = vrot.lane.b32.xlu0 %v2222_v2, %s2128_s15  ;;  %251 = vmatpush.msra.mxu2 %v120_v0  ;;  %v229_v7 = vadd.f32 %v2226_v4, %v2224_v3  ;;  %v230_v11 = vadd.f32 %v2245_v10, %v2243_v9  ;;  %v114_v16 = vld [vmem:[#allocation8] sm:$0xff]  ;;  %v113_v21 = vld [vmem:[#allocation5 + $0x8] sm:$0xff]  ;;  %s2133_s7 = smov 24   ;;  %vm803_vm3 = vcmask 195584   ;;  %s2134_s28 = smov 96  }
  0x1a   :  { %v2238_v8 = vpack.i.bf16 %v118_v5, %v119_v6  ;;  %v116_v19 = vadd.f32 %v114_v16, %v112_v15  ;;  %v115_v22 = vld [vmem:[#allocation8 + $0x8] sm:$0xff]  ;;  %v1874_v25 = vld [vmem:[#allocation10] ss:$0 sm:$0xff]  ;;  %v2286_v34 = vld [vmem:[%s2603_s4 + $0x50] sm:$0xff]  ;;  %s2135_s29 = smov 88   ;;  %s2137_s30 = smov 80  }
  0x1b   :  { %252 = vmatpush.msra.mxu2 %v119_v6  ;;  %v117_v23 = vadd.f32 %v115_v22, %v113_v21  ;;  %v1875_v28 = vld [vmem:[%s2605_s6] ss:$0 sm:$0xff]  ;;  %v2291_v35 = vld [vmem:[%s2603_s4 + $0x38] sm:$0xff]  ;;  %218 = vmatpush.msra.mxu1 %v2286_v34  ;;  %v2304_v37 = vld [vmem:[%s2603_s4 + $0x8] sm:$0xff]  ;;  %s2138_s9 = smov 72   ;;  %s2139_s12 = smov 32  }
  0x1c   :  { %v2297_v36 = vld [vmem:[%s2603_s4 + $0x20] sm:$0xff]  ;;  %s1720_s19 = sshll.u32 %s2607_s8, 4  ;;  %s1721_s19 = int_to_ptr.hbm [resolvable:$true] %s1720_s19 }
  0x1d   :  { %253 = vmatpush.msra.mxu2 %v118_v5  ;;  %219 = vmatpush.msra.mxu1 %v2291_v35  ;;  %v1876_v54 = vld [vmem:[%s2605_s6 + $0x1] ss:$0 sm:$0xff] }
  0x1e   :  { %1739 = vmatmul.msk.f32.vlgmr.msra.gmra.mxu2 %vm169_vm0, %v229_v7 }
  0x1f   :  { %220 = vmatpush.msra.mxu1 %v2297_v36 }
  0x21   :  { %1825 = vrot.lane.b32.xlu0 %v2238_v8, %s2128_s15  ;;  %221 = vmatpush.msra.mxu1 %v2304_v37 }
  0x22   :  { %1737 = vmatmul.msk.f32.vlgmr.msra.gmra.mxu1 %vm169_vm0, %v112_v15 }
  0x26   :  { %1740 = vmatmul.msk.f32.gmra.mxu2 %vm169_vm0, %v230_v11 }
  0x2a   :  { %1738 = vmatmul.msk.f32.gmra.mxu1 %vm169_vm0, %v113_v21 }
  0x8b   :  { %v1821_v12 = vpop.permute.xlu0 %1820 }
  0x8c   :  { %v1822_v13 = vunpack.i.l.bf16 %v1821_v12  ;;  %v1823_v14 = vunpack.i.h.bf16 %v1821_v12 }
  0x8e   :  { %188 = vmatpush.msra.mxu0 %v1822_v13 }
  0x90   :  { %189 = vmatpush.msra.mxu0 %v1823_v14 }
  0x93   :  { %v1826_v17 = vpop.permute.xlu0 %1825 }
  0x94   :  { %v1827_v18 = vunpack.i.l.bf16 %v1826_v17  ;;  %v1828_v20 = vunpack.i.h.bf16 %v1826_v17 }
  0x96   :  { %190 = vmatpush.msra.mxu0 %v1827_v18 }
  0x98   :  { %191 = vmatpush.msra.mxu0 %v1828_v20 }
  0x99   :  { %1735 = vmatmul.msk.f32.vlgmr.msra.gmra.mxu0 %vm169_vm0, %v116_v19 }
  0x9f   :  { %v223_v55 = vpop.f32.mrf.mxu1 }
  0xa0   :  { %v2326_v56 = vadd.f32 %v1876_v54, %v223_v55 }
  0xa1   :  { %1736 = vmatmul.msk.f32.gmra.mxu0 %vm169_vm0, %v117_v23  ;;  %v255_v24 = vpop.f32.mrf.mxu2 }
  0xa2   :  { %v256_v31 = vadd.f32 %v1874_v25, %v255_v24 }
  0xa7   :  { %v226_v57 = vpop.f32.mrf.mxu1 }
  0xa8   :  { %v2329_v58 = vadd.f32 %v1876_v54, %v226_v57 }
  0xa9   :  { %v258_v26 = vpop.f32.mrf.mxu2 }
  0xaa   :  { %v259_v27 = vadd.f32 %v1874_v25, %v258_v26 }
  0xac   :  { %410 = vrot.lane.b32.xlu0 %v259_v27, %s2129_s16 }
 0x116   :  { %v193_v29 = vpop.f32.mrf.mxu0 }
 0x117   :  { %v2256_v30 = vadd.f32 %v1875_v28, %v193_v29 }
 0x119   :  { %516 = vrot.lane.b32.xlu2 %v2256_v30, %s2130_s1  ;;  %384 = vrot.lane.b32.xlu1 %v2256_v30, %s2129_s16 }
 0x11a   :  { %1741 = vmatpush.xpose.msk.msrb.mxu0 %vm261_vm1, %v2256_v30  ;;  %646 = vrot.lane.b32.xlu0 %v2256_v30, %s2131_s3 }
 0x11d   :  { %1742 = vmatmul.msk.f32.vlgmr.msrb.gmra.mxu0 %vm261_vm1, %v256_v31 }
 0x11e   :  { %v196_v32 = vpop.f32.mrf.mxu0  ;;  %v411_v40 = vpop.permute.xlu0 %410  ;;  %377 = vmatpush.msra.mxu0 %v2329_v58 }
 0x11f   :  { %v2267_v33 = vadd.f32 %v1875_v28, %v196_v32 }
 0x121   :  { %1743 = vmatpush.xpose.msk.msra.mxu3 %vm261_vm1, %v2267_v33  ;;  %412 = vrot.lane.b32.xlu2 %v2267_v33, %s2129_s16 }
 0x122   :  { %382 = vrot.lane.b32.xlu1 %v256_v31, %s2129_s16  ;;  %674 = vrot.lane.b32.xlu0 %v2267_v33, %s2131_s3 }
 0x124   :  { %1744 = vmatmul.msk.f32.vlgmr.msra.gmra.mxu3 %vm261_vm1, %v259_v27 }
 0x125   :  { %354 = vmatpush.msrb.mxu3 %v2326_v56 }
 0x129   :  { %544 = vrot.lane.b32.xlu2 %v2267_v33, %s2130_s1 }
 0x12a   :  { %514 = vrot.lane.b32.xlu1 %v256_v31, %s2130_s1 }
 0x131   :  { %644 = vrot.lane.b32.xlu2 %v256_v31, %s2131_s3 }
 0x132   :  { %542 = vrot.lane.b32.xlu1 %v259_v27, %s2130_s1 }
 0x13a   :  { %672 = vrot.lane.b32.xlu1 %v259_v27, %s2131_s3 }
 0x173   :  { %v517_v38 = vpop.permute.xlu2 %516 }
 0x17b   :  { %v413_v39 = vpop.permute.xlu2 %412 }
 0x17c   :  { %1749 = vmatpush.xpose.msk.msrb.mxu2 %vm261_vm1, %v413_v39 }
 0x17f   :  { %1750 = vmatmul.msk.f32.vlgmr.msrb.gmra.mxu2 %vm261_vm1, %v411_v40 }
 0x183   :  { %v545_v41 = vpop.permute.xlu2 %544 }
 0x184   :  { %1755 = vmatpush.xpose.msk.msra.mxu2 %vm261_vm1, %v545_v41 }
 0x18b   :  { %v385_v42 = vpop.permute.xlu1 %384  ;;  %v645_v49 = vpop.permute.xlu2 %644 }
 0x18c   :  { %v647_v43 = vpop.permute.xlu0 %646  ;;  %1747 = vmatpush.xpose.msk.msrb.mxu1 %vm261_vm1, %v385_v42 }
 0x190   :  { %1753 = vmatpush.xpose.msk.msra.mxu1 %vm261_vm1, %v517_v38 }
 0x194   :  { %v383_v44 = vpop.permute.xlu1 %382  ;;  %v675_v45 = vpop.permute.xlu0 %674 }
 0x195   :  { %1748 = vmatmul.msk.f32.vlgmr.msrb.gmra.mxu1 %vm261_vm1, %v383_v44  ;;  %1761 = vmatpush.xpose.msk.msrb.mxu2 %vm261_vm1, %v675_v45 }
 0x196   :  { %1759 = vmatpush.xpose.msk.msrb.mxu1 %vm261_vm1, %v647_v43 }
 0x19a   :  { %v285_v46 = vpop.f32.mrf.mxu0 }
 0x19b   :  { %v314_v47 = vsel %vm261_vm1, %v285_v46, -inf }
 0x19c   :  { %v515_v48 = vpop.permute.xlu1 %514  ;;  %315 = vmax.xlane.f32.xlu2 %v314_v47 }
 0x19d   :  { %1754 = vmatmul.msk.f32.vlgmr.msra.gmra.mxu1 %vm261_vm1, %v515_v48 }
 0x1a4   :  { %v543_v50 = vpop.permute.xlu1 %542 }
 0x1a5   :  { %1756 = vmatmul.msk.f32.vlgmr.msra.gmra.mxu2 %vm261_vm1, %v543_v50  ;;  %1760 = vmatmul.msk.f32.vlgmr.msrb.gmra.mxu1 %vm261_vm1, %v645_v49 }
 0x1a7   :  { %v311_v51 = vpop.f32.mrf.mxu3 }
 0x1a8   :  { %v317_v52 = vsel %vm261_vm1, %v311_v51, -inf }
 0x1a9   :  { %318 = vmax.xlane.f32.xlu1 %v317_v52 }
 0x1ac   :  { %v673_v53 = vpop.permute.xlu1 %672 }
 0x1ad   :  { %1762 = vmatmul.msk.f32.vlgmr.msrb.gmra.mxu2 %vm261_vm1, %v673_v53 }
 0x202   :  { %v435_v12 = vpop.f32.mrf.mxu2 }
 0x203   :  { %v441_v14 = vsel %vm261_vm1, %v435_v12, -inf }
 0x20f   :  { %v316_v59 = vpop.xlane.xlu2 %315 }
 0x210   :  { %v320_v60 = vsub.f32 %v285_v46, %v316_v59 }
 0x212   :  { %v322_v61 = vmul.f32 1.442695, %v320_v60  ;;  %v407_v62 = vpop.f32.mrf.mxu1 }
 0x213   :  { %v438_v63 = vsel %vm261_vm1, %v407_v62, -inf }
 0x214   :  { %1888 = vpow2.f32 %v322_v61  ;;  %439 = vmax.xlane.f32.xlu0 %v438_v63 }
 0x21a   :  { %v1889_v0 = vpop.eup %1888  ;;  %v539_v1 = vpop.f32.mrf.mxu1 }
 0x21b   :  { %v570_v5 = vsel %vm261_vm1, %v539_v1, -inf  ;;  %v326_v6 = vsel %vm261_vm1, %v1889_v0, 0.0 }
 0x21c   :  { %571 = vmax.xlane.f32.xlu2 %v570_v5  ;;  %327 = vadd.xlane.f32.xlu0 %v326_v6  ;;  %v319_v7 = vpop.xlane.xlu1 %318 }
 0x21d   :  { %v321_v11 = vsub.f32 %v311_v51, %v319_v7 }
 0x21f   :  { %v324_v13 = vmul.f32 1.442695, %v321_v11 }
 0x221   :  { %1890 = vpow2.f32 %v324_v13 }
 0x222   :  { %v669_v15 = vpop.f32.mrf.mxu1 }
 0x223   :  { %v700_v16 = vsel %vm261_vm1, %v669_v15, -inf }
 0x224   :  { %442 = vmax.xlane.f32.xlu2 %v441_v14  ;;  %701 = vmax.xlane.f32.xlu0 %v700_v16 }
 0x227   :  { %v1891_v17 = vpop.eup %1890 }
 0x228   :  { %v567_v18 = vpop.f32.mrf.mxu2  ;;  %v329_v20 = vsel %vm261_vm1, %v1891_v17, 0.0 }
 0x229   :  { %v573_v19 = vsel %vm261_vm1, %v567_v18, -inf }
 0x22a   :  { %574 = vmax.xlane.f32.xlu1 %v573_v19 }
 0x22c   :  { %330 = vadd.xlane.f32.xlu2 %v329_v20 }
 0x230   :  { %v697_v21 = vpop.f32.mrf.mxu2 }
 0x231   :  { %v703_v22 = vsel %vm261_vm1, %v697_v21, -inf }
 0x234   :  { %704 = vmax.xlane.f32.xlu2 %v703_v22 }
 0x238   :  { %722 = vrot.lane.b32.xlu0 %v2326_v56, %s2131_s3 }
 0x24c   :  { %592 = vrot.lane.b32.xlu2 %v2326_v56, %s2130_s1 }
 0x287   :  { %v440_v23 = vpop.xlane.xlu0 %439 }
 0x288   :  { %v444_v24 = vsub.f32 %v407_v62, %v440_v23  ;;  %v2359_v62 = vpack.i.bf16 %v2329_v58, %v2326_v56 }
 0x28a   :  { %v446_v25 = vmul.f32 1.442695, %v444_v24 }
 0x28c   :  { %1892 = vpow2.f32 %v446_v25 }
 0x28f   :  { %v328_v26 = vpop.xlane.xlu0 %327  ;;  %v572_v27 = vpop.xlane.xlu2 %571 }
 0x290   :  { %1894 = vrcp.f32 %v328_v26  ;;  %v576_v28 = vsub.f32 %v539_v1, %v572_v27 }
 0x292   :  { %v2344_v29 = vpop.eup %1892  ;;  %v578_v31 = vmul.f32 1.442695, %v576_v28 }
 0x293   :  { %v450_v32 = vsel %vm261_vm1, %v2344_v29, 0.0 }
 0x294   :  { %1896 = vpow2.f32 %v578_v31  ;;  %451 = vadd.xlane.f32.xlu1 %v450_v32 }
 0x296   :  { %v1895_v38 = vpop.eup %1894 }
 0x297   :  { %v702_v39 = vpop.xlane.xlu0 %701  ;;  %v443_v40 = vpop.xlane.xlu2 %442  ;;  %v334_v41 = vmul.f32 %v1895_v38, %v1889_v0 }
 0x298   :  { %v706_v42 = vsub.f32 %v669_v15, %v702_v39  ;;  %v445_v43 = vsub.f32 %v435_v12, %v443_v40 }
 0x299   :  { %1745 = vmatmul.msk.f32.vlgmr.msrb.gmra.mxu3 %vm261_vm1, %v334_v41  ;;  %v1834_v41 = vpack.i.bf16 %v2291_v35, %v2286_v34 }
 0x29a   :  { %v2349_v44 = vpop.eup %1896  ;;  %v708_v45 = vmul.f32 1.442695, %v706_v42  ;;  %v448_v46 = vmul.f32 1.442695, %v445_v43  ;;  %v1839_v42 = vpack.i.bf16 %v2304_v37, %v2297_v36 }
 0x29b   :  { %v582_v47 = vsel %vm261_vm1, %v2349_v44, 0.0 }
 0x29c   :  { %1898 = vpow2.f32 %v708_v45  ;;  %583 = vadd.xlane.f32.xlu0 %v582_v47 }
 0x29d   :  { %1900 = vpow2.f32 %v448_v46  ;;  %v575_v48 = vpop.xlane.xlu1 %574 }
 0x29e   :  { %v577_v49 = vsub.f32 %v567_v18, %v575_v48 }
 0x29f   :  { %v331_v50 = vpop.xlane.xlu2 %330 }
 0x2a0   :  { %v580_v51 = vmul.f32 1.442695, %v577_v49  ;;  %1902 = vrcp.f32 %v331_v50 }
 0x2a2   :  { %v1899_v52 = vpop.eup %1898  ;;  %1904 = vpow2.f32 %v580_v51 }
 0x2a3   :  { %v1901_v53 = vpop.eup %1900  ;;  %v712_v54 = vsel %vm261_vm1, %v1899_v52, 0.0 }
 0x2a4   :  { %713 = vadd.xlane.f32.xlu0 %v712_v54  ;;  %v453_v55 = vsel %vm261_vm1, %v1901_v53, 0.0 }
 0x2a5   :  { %454 = vadd.xlane.f32.xlu2 %v453_v55 }
 0x2a6   :  { %v1903_v57 = vpop.eup %1902 }
 0x2a7   :  { %v335_v59 = vmul.f32 %v1903_v57, %v1891_v17  ;;  %v705_v63 = vpop.xlane.xlu2 %704 }
 0x2a8   :  { %v1905_v60 = vpop.eup %1904  ;;  %v707_v0 = vsub.f32 %v697_v21, %v705_v63 }
 0x2a9   :  { %1746 = vmatmul.msk.f32.vlgmr.msra.gmra.mxu0 %vm261_vm1, %v335_v59  ;;  %v585_v61 = vsel %vm261_vm1, %v1905_v60, 0.0 }
 0x2aa   :  { %v710_v1 = vmul.f32 1.442695, %v707_v0  ;;  %v723_v7 = vpop.permute.xlu0 %722 }
 0x2ac   :  { %586 = vadd.xlane.f32.xlu0 %v585_v61  ;;  %1906 = vpow2.f32 %v710_v1 }
 0x2ad   :  { %1830 = vrot.lane.b32.xlu1 %v2359_v62, %s2129_s16 }
 0x2af   :  { %v593_v12 = vpop.permute.xlu2 %592 }
 0x2b2   :  { %v1907_v5 = vpop.eup %1906 }
 0x2b3   :  { %v715_v6 = vsel %vm261_vm1, %v1907_v5, 0.0 }
 0x2bd   :  { %618 = vrot.lane.b32.xlu2 %v2329_v58, %s2130_s1 }
 0x2c0   :  { %748 = vrot.lane.b32.xlu0 %v2329_v58, %s2131_s3 }
 0x2c5   :  { %1835 = vrot.lane.b32.xlu2 %v1834_v41, %s2128_s15 }
 0x2cd   :  { %1840 = vrot.lane.b32.xlu2 %v1839_v42, %s2128_s15 }
 0x2d7   :  { %716 = vadd.xlane.f32.xlu1 %v715_v6 }
 0x307   :  { %v452_v13 = vpop.xlane.xlu1 %451 }
 0x308   :  { %1908 = vrcp.f32 %v452_v13 }
 0x30e   :  { %v1909_v16 = vpop.eup %1908 }
 0x30f   :  { %v584_v11 = vpop.xlane.xlu0 %583  ;;  %v458_v22 = vmul.f32 %v1909_v16, %v2344_v29 }
 0x317   :  { %v714_v14 = vpop.xlane.xlu0 %713 }
 0x318   :  { %v455_v15 = vpop.xlane.xlu2 %454 }
 0x319   :  { %1910 = vrcp.f32 %v455_v15 }
 0x31a   :  { %1912 = vrcp.f32 %v584_v11  ;;  %v1877_v11 = vld [vmem:[#allocation10 + $0x2] ss:$0 sm:$0xff] }
 0x31f   :  { %v1911_v17 = vpop.eup %1910  ;;  %v1831_v18 = vpop.permute.xlu1 %1830 }
 0x320   :  { %v587_v19 = vpop.xlane.xlu0 %586  ;;  %v1833_v20 = vunpack.i.h.bf16 %v1831_v18  ;;  %v1832_v21 = vunpack.i.l.bf16 %v1831_v18  ;;  %v459_v23 = vmul.f32 %v1911_v17, %v1901_v53  ;;  %v619_v24 = vpop.permute.xlu2 %618 }
 0x321   :  { %1914 = vrcp.f32 %v587_v19  ;;  %v1913_v25 = vpop.eup %1912 }
 0x322   :  { %482 = vmatpush.msra.mxu3 %v1832_v21  ;;  %509 = vmatpush.msrb.mxu0 %v1833_v20  ;;  %1916 = vrcp.f32 %v714_v14  ;;  %v590_v27 = vmul.f32 %v1913_v25, %v2349_v44  ;;  %v356_v44 = vpop.f32.mrf.mxu3 }
 0x323   :  { %1751 = vmatmul.msk.f32.vlgmr.msra.gmra.mxu3 %vm261_vm1, %v458_v22  ;;  %1752 = vmatmul.msk.f32.vlgmr.msrb.gmra.mxu0 %vm261_vm1, %v459_v23 }
 0x324   :  { %613 = vmatpush.msrb.mxu3 %v593_v12  ;;  %639 = vmatpush.msra.mxu0 %v619_v24 }
 0x326   :  { %743 = vmatpush.msra.mxu3 %v723_v7  ;;  %v379_v43 = vpop.f32.mrf.mxu0 }
 0x327   :  { %v1915_v26 = vpop.eup %1914 }
 0x328   :  { %v591_v28 = vmul.f32 %v1915_v26, %v1905_v60  ;;  %v1917_v29 = vpop.eup %1916  ;;  %v1836_v37 = vpop.permute.xlu2 %1835 }
 0x329   :  { %v720_v31 = vmul.f32 %v1917_v29, %v1899_v52  ;;  %v1838_v49 = vunpack.i.h.bf16 %v1836_v37  ;;  %v1837_v50 = vunpack.i.l.bf16 %v1836_v37 }
 0x32b   :  { %1757 = vmatmul.msk.f32.vlgmr.msrb.gmra.mxu3 %vm261_vm1, %v590_v27  ;;  %1758 = vmatmul.msk.f32.vlgmr.msra.gmra.mxu0 %vm261_vm1, %v591_v28 }
 0x32c   :  { %841 = vmatpush.msra.mxu1 %v1837_v50 }
 0x32e   :  { %842 = vmatpush.msra.mxu1 %v1838_v49 }
 0x330   :  { %v1841_v51 = vpop.permute.xlu2 %1840 }
 0x331   :  { %v1843_v52 = vunpack.i.h.bf16 %v1841_v51  ;;  %v1842_v53 = vunpack.i.l.bf16 %v1841_v51 }
 0x332   :  { %v749_v32 = vpop.permute.xlu0 %748 }
 0x333   :  { %1763 = vmatmul.msk.f32.vlgmr.msra.gmra.mxu3 %vm261_vm1, %v720_v31  ;;  %769 = vmatpush.msrb.mxu0 %v749_v32 }
 0x334   :  { %843 = vmatpush.msra.mxu1 %v1842_v53 }
 0x336   :  { %844 = vmatpush.msra.mxu1 %v1843_v52 }
 0x34a   :  { %v717_v38 = vpop.xlane.xlu1 %716 }
 0x34b   :  { %1918 = vrcp.f32 %v717_v38 }
 0x351   :  { %v1919_v39 = vpop.eup %1918 }
 0x352   :  { %v721_v40 = vmul.f32 %v1919_v39, %v1907_v5 }
 0x354   :  { %1764 = vmatmul.msk.f32.vlgmr.msrb.gmra.mxu0 %vm261_vm1, %v721_v40 }
 0x3a0   :  { %v511_v45 = vpop.f32.mrf.mxu0 }
 0x3a1   :  { %778 = vrot.lane.b32.xlu1 %v511_v45, %s2123_s14 }
 0x3a6   :  { %v484_v46 = vpop.f32.mrf.mxu3 }
 0x3a7   :  { %776 = vrot.lane.b32.xlu0 %v484_v46, %s2123_s14 }
 0x3a8   :  { %v641_v34 = vpop.f32.mrf.mxu0 }
 0x3ae   :  { %v615_v47 = vpop.f32.mrf.mxu3 }
 0x3af   :  { %784 = vrot.lane.b32.xlu0 %v615_v47, %s2132_s27 }
 0x3b6   :  { %v745_v48 = vpop.f32.mrf.mxu3 }
 0x3b7   :  { %792 = vrot.lane.b32.xlu2 %v745_v48, %s2133_s7  ;;  %786 = vrot.lane.b32.xlu0 %v641_v34, %s2132_s27 }
 0x3d1   :  { %v771_v36 = vpop.f32.mrf.mxu0 }
 0x3d2   :  { %794 = vrot.lane.b32.xlu2 %v771_v36, %s2133_s7 }
 0x411   :  { %v793_v59 = vpop.permute.xlu2 %792 }
 0x413   :  { %v779_v63 = vpop.permute.xlu1 %778 }
 0x414   :  { %v799_v1 = vsel %vm261_vm1, %v379_v43, %v779_v63  ;;  %v1879_v63 = vld [vmem:[#allocation10 + $0x6] ss:$0 sm:$0xff] }
 0x419   :  { %v777_v54 = vpop.permute.xlu0 %776 }
 0x41a   :  { %v798_v55 = vsel %vm261_vm1, %v356_v44, %v777_v54  ;;  %v1878_v54 = vld [vmem:[#allocation10 + $0x5] ss:$0 sm:$0xff] }
 0x421   :  { %v785_v57 = vpop.permute.xlu0 %784 }
 0x422   :  { %v801_v60 = vsel %vm800_vm2, %v798_v55, %v785_v57 }
 0x423   :  { %v804_v61 = vsel %vm803_vm3, %v801_v60, %v793_v59 }
 0x424   :  { %1765 = vmatmul.msk.f32.vlgmr.msra.gmra.mxu1 %vm169_vm0, %v804_v61 }
 0x429   :  { %v787_v0 = vpop.permute.xlu0 %786 }
 0x42a   :  { %v802_v5 = vsel %vm800_vm2, %v799_v1, %v787_v0 }
 0x42c   :  { %v795_v6 = vpop.permute.xlu2 %794 }
 0x42d   :  { %v805_v7 = vsel %vm803_vm3, %v802_v5, %v795_v6 }
 0x42e   :  { %1766 = vmatmul.msk.f32.gmra.mxu1 %vm169_vm0, %v805_v7 }
 0x4a1   :  { %v846_v12 = vpop.f32.mrf.mxu1 }
 0x4a2   :  { %v847_v13 = vadd.f32 %v1877_v11, %v846_v12 }
 0x4a4   :  { %v852_v14 = vadd.f32 %v847_v13, %v2224_v3  ;;  %v2136_v3 = vmov 32.0  }
 0x4a5   :  { %1920 = vrcp.f32 %v2136_v3 }
 0x4a6   :  { %v854_v15 = vsel %vm169_vm0, %v852_v14, 0.0 }
 0x4a7   :  { %855 = vadd.xlane.f32.xlu0 %v854_v15 }
 0x4ab   :  { %v849_v16 = vpop.f32.mrf.mxu1  ;;  %v1921_v20 = vpop.eup %1920 }
 0x4ac   :  { %v850_v17 = vadd.f32 %v1877_v11, %v849_v16  ;;  %v861_v21 = vmul.f32 32.0, %v1921_v20  ;;  %vm865_vm4 = vweird.f32 %v1921_v20 }
 0x4ae   :  { %v853_v18 = vadd.f32 %v850_v17, %v2243_v9  ;;  %v862_v22 = vsub.f32 1.0, %v861_v21 }
 0x4b0   :  { %v857_v19 = vsel %vm169_vm0, %v853_v18, 0.0  ;;  %v863_v9 = vmul.f32 %v1921_v20, %v862_v22  ;;  %v1880_v22 = vld [vmem:[#allocation10 + $0x1] ss:$0 sm:$0xff] }
 0x4b1   :  { %858 = vadd.xlane.f32.xlu2 %v857_v19 }
 0x4b2   :  { %v864_v23 = vadd.f32 %v1921_v20, %v863_v9 }
 0x4b4   :  { %v2406_v24 = vsel %vm865_vm4, %v1921_v20, %v864_v23 }
 0x4c9   :  { %1845 = vrot.lane.b32.xlu2 %v2222_v2, %s2134_s28 }
 0x4d1   :  { %1085 = vrot.lane.b32.xlu2 %v2256_v30, %s2135_s29 }
 0x4d9   :  { %982 = vrot.lane.b32.xlu2 %v2267_v33, %s2134_s28 }
 0x51a   :  { %v856_v25 = vpop.xlane.xlu0 %855 }
 0x51b   :  { %v867_v2 = vmul.f32 %v2406_v24, %v856_v25 }
 0x51d   :  { %v869_v26 = vsub.f32 %v852_v14, %v867_v2 }
 0x51f   :  { %v871_v27 = vmul.f32 %v869_v26, %v869_v26 }
 0x521   :  { %v873_v28 = vsel %vm169_vm0, %v871_v27, 0.0 }
 0x522   :  { %874 = vadd.xlane.f32.xlu1 %v873_v28 }
 0x524   :  { %v859_v29 = vpop.xlane.xlu2 %858 }
 0x525   :  { %v868_v31 = vmul.f32 %v2406_v24, %v859_v29 }
 0x527   :  { %v870_v32 = vsub.f32 %v853_v18, %v868_v31 }
 0x529   :  { %v872_v38 = vmul.f32 %v870_v32, %v870_v32 }
 0x52b   :  { %v876_v39 = vsel %vm169_vm0, %v872_v38, 0.0 }
 0x52c   :  { %v1846_v40 = vpop.permute.xlu2 %1845  ;;  %877 = vadd.xlane.f32.xlu0 %v876_v39 }
 0x52d   :  { %v1848_v41 = vunpack.i.h.bf16 %v1846_v40  ;;  %v1847_v42 = vunpack.i.l.bf16 %v1846_v40 }
 0x52f   :  { %944 = vmatpush.msra.mxu2 %v1847_v42 }
 0x531   :  { %945 = vmatpush.msra.mxu2 %v1848_v41 }
 0x534   :  { %v1086_v43 = vpop.permute.xlu2 %1085 }
 0x535   :  { %1775 = vmatpush.xpose.msk.msrb.mxu1 %vm261_vm1, %v1086_v43 }
 0x53b   :  { %955 = vrot.lane.b32.xlu1 %v2256_v30, %s2134_s28 }
 0x53c   :  { %v983_v44 = vpop.permute.xlu2 %982 }
 0x53d   :  { %1771 = vmatpush.xpose.msk.msra.mxu0 %vm261_vm1, %v983_v44 }
 0x540   :  { %1850 = vrot.lane.b32.xlu0 %v2238_v8, %s2134_s28 }
 0x543   :  { %1215 = vrot.lane.b32.xlu1 %v2256_v30, %s2137_s30 }
 0x548   :  { %1113 = vrot.lane.b32.xlu0 %v2267_v33, %s2135_s29 }
 0x54b   :  { %1243 = vrot.lane.b32.xlu1 %v2267_v33, %s2137_s30 }
 0x595   :  { %v875_v45 = vpop.xlane.xlu1 %874 }
 0x596   :  { %v879_v46 = vmul.f32 %v875_v45, %v2406_v24 }
 0x598   :  { %v881_v47 = vadd.f32 1e-05, %v879_v46 }
 0x59a   :  { %1922 = vrsqrt.f32 %v881_v47  ;;  %vm889_vm6 = vweird.f32 %v881_v47 }
 0x59f   :  { %v878_v34 = vpop.xlane.xlu0 %877 }
 0x5a0   :  { %v1923_v48 = vpop.eup %1922  ;;  %v880_v36 = vmul.f32 %v878_v34, %v2406_v24 }
 0x5a1   :  { %v884_v8 = vmul.f32 %v1923_v48, %v881_v47  ;;  %vm890_vm5 = vweird.f32 %v1923_v48 }
 0x5a2   :  { %v882_v37 = vadd.f32 1e-05, %v880_v36  ;;  %vm891_vm7 = vmor %vm889_vm6, %vm890_vm5 }
 0x5a3   :  { %v885_v49 = vmul.f32 %v1923_v48, %v884_v8 }
 0x5a4   :  { %1924 = vrsqrt.f32 %v882_v37  ;;  %vm899_vm9 = vweird.f32 %v882_v37 }
 0x5a5   :  { %v886_v50 = vmul.f32 0.5, %v885_v49 }
 0x5a7   :  { %v887_v51 = vsub.f32 1.5, %v886_v50 }
 0x5a9   :  { %v888_v52 = vmul.f32 %v1923_v48, %v887_v51 }
 0x5aa   :  { %v1925_v53 = vpop.eup %1924 }
 0x5ab   :  { %v892_v55 = vsel %vm891_vm7, %v1923_v48, %v888_v52  ;;  %v894_v57 = vmul.f32 %v1925_v53, %v882_v37  ;;  %vm900_vm8 = vweird.f32 %v1925_v53 }
 0x5ac   :  { %v903_v59 = vmul.f32 %v892_v55, %v869_v26  ;;  %vm901_vm10 = vmor %vm899_vm9, %vm900_vm8 }
 0x5ad   :  { %v895_v60 = vmul.f32 %v1925_v53, %v894_v57  ;;  %v956_v61 = vpop.permute.xlu1 %955 }
 0x5ae   :  { %v906_v0 = vmul.f32 %v1878_v54, %v903_v59  ;;  %1769 = vmatpush.xpose.msk.msrb.mxu3 %vm261_vm1, %v956_v61 }
 0x5af   :  { %v896_v1 = vmul.f32 0.5, %v895_v60 }
 0x5b0   :  { %v2427_v6 = vadd.f32 %v1879_v63, %v906_v0 }
 0x5b1   :  { %v897_v5 = vsub.f32 1.5, %v896_v1 }
 0x5b2   :  { %v1851_v7 = vpop.permute.xlu0 %1850  ;;  %v911_v17 = vadd.f32 %v2427_v6, %v2226_v4 }
 0x5b3   :  { %v898_v11 = vmul.f32 %v1925_v53, %v897_v5  ;;  %v1852_v12 = vunpack.i.l.bf16 %v1851_v7  ;;  %v1853_v14 = vunpack.i.h.bf16 %v1851_v7 }
 0x5b5   :  { %v902_v13 = vsel %vm901_vm10, %v1925_v53, %v898_v11  ;;  %v1216_v15 = vpop.permute.xlu1 %1215  ;;  %946 = vmatpush.msra.mxu2 %v1852_v12 }
 0x5b6   :  { %v904_v16 = vmul.f32 %v902_v13, %v870_v32  ;;  %1781 = vmatpush.xpose.msk.msra.mxu1 %vm261_vm1, %v1216_v15 }
 0x5b7   :  { %947 = vmatpush.msra.mxu2 %v1853_v14 }
 0x5b8   :  { %1767 = vmatmul.msk.f32.vlgmr.msra.gmra.mxu2 %vm169_vm0, %v911_v17  ;;  %v907_v18 = vmul.f32 %v1878_v54, %v904_v16 }
 0x5ba   :  { %v1114_v19 = vpop.permute.xlu0 %1113  ;;  %v2433_v3 = vadd.f32 %v1879_v63, %v907_v18 }
 0x5bb   :  { %1777 = vmatpush.xpose.msk.msrb.mxu2 %vm261_vm1, %v1114_v19 }
 0x5bc   :  { %v912_v21 = vadd.f32 %v2433_v3, %v2245_v10 }
 0x5bd   :  { %v1244_v20 = vpop.permute.xlu1 %1243 }
 0x5bf   :  { %1783 = vmatpush.xpose.msk.msra.mxu2 %vm261_vm1, %v1244_v20 }
 0x5c0   :  { %1768 = vmatmul.msk.f32.gmra.mxu2 %vm169_vm0, %v912_v21 }
 0x63b   :  { %v949_v9 = vpop.f32.mrf.mxu2 }
 0x63c   :  { %v950_v4 = vadd.f32 %v1880_v22, %v949_v9 }
 0x63e   :  { %1343 = vrot.lane.b32.xlu1 %v950_v4, %s2131_s3  ;;  %1083 = vrot.lane.b32.xlu0 %v950_v4, %s2129_s16 }
 0x63f   :  { %1770 = vmatmul.msk.f32.vlgmr.msrb.gmra.mxu3 %vm261_vm1, %v950_v4 }
 0x643   :  { %v952_v23 = vpop.f32.mrf.mxu2 }
 0x644   :  { %v953_v25 = vadd.f32 %v1880_v22, %v952_v23 }
 0x646   :  { %1111 = vrot.lane.b32.xlu2 %v953_v25, %s2129_s16  ;;  %1772 = vmatmul.msk.f32.vlgmr.msra.gmra.mxu0 %vm261_vm1, %v953_v25 }
 0x647   :  { %1213 = vrot.lane.b32.xlu0 %v950_v4, %s2130_s1 }
 0x64e   :  { %1345 = vrot.lane.b32.xlu2 %v2256_v30, %s2138_s9 }
 0x64f   :  { %1241 = vrot.lane.b32.xlu0 %v953_v25, %s2130_s1 }
 0x656   :  { %1373 = vrot.lane.b32.xlu2 %v2267_v33, %s2138_s9 }
 0x657   :  { %1371 = vrot.lane.b32.xlu0 %v953_v25, %s2131_s3 }
 0x6a0   :  { %v1112_v10 = vpop.permute.xlu2 %1111 }
 0x6a1   :  { %1778 = vmatmul.msk.f32.vlgmr.msrb.gmra.mxu2 %vm261_vm1, %v1112_v10 }
 0x6a8   :  { %v1346_v2 = vpop.permute.xlu2 %1345 }
 0x6b0   :  { %v1374_v26 = vpop.permute.xlu2 %1373  ;;  %v1084_v27 = vpop.permute.xlu0 %1083 }
 0x6b1   :  { %1789 = vmatpush.xpose.msk.msrb.mxu2 %vm261_vm1, %v1374_v26  ;;  %1776 = vmatmul.msk.f32.vlgmr.msrb.gmra.mxu1 %vm261_vm1, %v1084_v27  ;;  %v1344_v28 = vpop.permute.xlu1 %1343 }
 0x6b2   :  { %1787 = vmatpush.xpose.msk.msrb.mxu1 %vm261_vm1, %v1346_v2 }
 0x6b9   :  { %v1214_v30 = vpop.permute.xlu0 %1213 }
 0x6ba   :  { %1782 = vmatmul.msk.f32.vlgmr.msra.gmra.mxu1 %vm261_vm1, %v1214_v30 }
 0x6c1   :  { %v1242_v29 = vpop.permute.xlu0 %1241 }
 0x6c2   :  { %v979_v33 = vpop.f32.mrf.mxu3  ;;  %1784 = vmatmul.msk.f32.vlgmr.msra.gmra.mxu2 %vm261_vm1, %v1242_v29  ;;  %1788 = vmatmul.msk.f32.vlgmr.msrb.gmra.mxu1 %vm261_vm1, %v1344_v28 }
 0x6c3   :  { %v1006_v31 = vpop.f32.mrf.mxu0  ;;  %v1009_v32 = vsel %vm261_vm1, %v979_v33, -inf }
 0x6c4   :  { %1010 = vmax.xlane.f32.xlu1 %v1009_v32  ;;  %v1012_v38 = vsel %vm261_vm1, %v1006_v31, -inf }
 0x6c5   :  { %1013 = vmax.xlane.f32.xlu0 %v1012_v38 }
 0x6c9   :  { %v1372_v39 = vpop.permute.xlu0 %1371 }
 0x6ca   :  { %1790 = vmatmul.msk.f32.vlgmr.msrb.gmra.mxu2 %vm261_vm1, %v1372_v39 }
 0x724   :  { %v2464_v34 = vpop.f32.mrf.mxu2 }
 0x725   :  { %v1142_v55 = vsel %vm261_vm1, %v2464_v34, -inf }
 0x72e   :  { %v1108_v40 = vpop.f32.mrf.mxu1 }
 0x72f   :  { %v1139_v41 = vsel %vm261_vm1, %v1108_v40, -inf }
 0x730   :  { %1140 = vmax.xlane.f32.xlu2 %v1139_v41 }
 0x737   :  { %v1238_v42 = vpop.f32.mrf.mxu1  ;;  %v1011_v43 = vpop.xlane.xlu1 %1010 }
 0x738   :  { %v1015_v44 = vsub.f32 %v979_v33, %v1011_v43  ;;  %v1269_v45 = vsel %vm261_vm1, %v1238_v42, -inf  ;;  %v1014_v47 = vpop.xlane.xlu0 %1013 }
 0x739   :  { %1270 = vmax.xlane.f32.xlu1 %v1269_v45  ;;  %v1016_v48 = vsub.f32 %v1006_v31, %v1014_v47 }
 0x73a   :  { %v1017_v46 = vmul.f32 1.442695, %v1015_v44 }
 0x73b   :  { %v1019_v37 = vmul.f32 1.442695, %v1016_v48 }
 0x73c   :  { %1926 = vpow2.f32 %v1017_v46 }
 0x73d   :  { %1928 = vpow2.f32 %v1019_v37 }
 0x73f   :  { %v2466_v36 = vpop.f32.mrf.mxu1 }
 0x740   :  { %v1399_v8 = vsel %vm261_vm1, %v2466_v36, -inf }
 0x741   :  { %1400 = vmax.xlane.f32.xlu0 %v1399_v8 }
 0x742   :  { %v1927_v49 = vpop.eup %1926 }
 0x743   :  { %v1021_v52 = vsel %vm261_vm1, %v1927_v49, 0.0  ;;  %v1929_v53 = vpop.eup %1928 }
 0x744   :  { %v1024_v54 = vsel %vm261_vm1, %v1929_v53, 0.0 }
 0x745   :  { %v1266_v50 = vpop.f32.mrf.mxu2 }
 0x746   :  { %v1272_v51 = vsel %vm261_vm1, %v1266_v50, -inf }
 0x747   :  { %1273 = vmax.xlane.f32.xlu1 %v1272_v51 }
 0x748   :  { %1855 = vrot.lane.b32.xlu2 %v2359_v62, %s2134_s28 }
 0x749   :  { %1022 = vadd.xlane.f32.xlu0 %v1021_v52 }
 0x74d   :  { %v1396_v57 = vpop.f32.mrf.mxu2 }
 0x74e   :  { %v1402_v59 = vsel %vm261_vm1, %v1396_v57, -inf }
 0x751   :  { %1025 = vadd.xlane.f32.xlu0 %v1024_v54 }
 0x765   :  { %1860 = vrot.lane.b32.xlu0 %v2359_v62, %s2135_s29 }
 0x771   :  { %1143 = vmax.xlane.f32.xlu2 %v1142_v55 }
 0x779   :  { %1403 = vmax.xlane.f32.xlu2 %v1402_v59 }
 0x791   :  { %1291 = vrot.lane.b32.xlu2 %v2326_v56, %s2137_s30 }
 0x7a3   :  { %v1141_v60 = vpop.xlane.xlu2 %1140 }
 0x7a4   :  { %v1145_v61 = vsub.f32 %v1108_v40, %v1141_v60 }
 0x7a6   :  { %v1147_v63 = vmul.f32 1.442695, %v1145_v61 }
 0x7a8   :  { %1930 = vpow2.f32 %v1147_v63 }
 0x7ab   :  { %v1856_v0 = vpop.permute.xlu2 %1855 }
 0x7ac   :  { %v1271_v1 = vpop.xlane.xlu1 %1270  ;;  %v1858_v5 = vunpack.i.h.bf16 %v1856_v0  ;;  %v1857_v7 = vunpack.i.l.bf16 %v1856_v0 }
 0x7ad   :  { %v1275_v62 = vsub.f32 %v1238_v42, %v1271_v1  ;;  %v1966_v1 = vld [vmem:[%s2603_s4 + $0x50] sm:$0xff] }
 0x7ae   :  { %v1931_v11 = vpop.eup %1930  ;;  %1052 = vmatpush.msra.mxu3 %v1857_v7  ;;  %1078 = vmatpush.msrb.mxu0 %v1858_v5  ;;  %v1864_v5 = vpack.i.bf16 %v2291_v35, %v1966_v1 }
 0x7af   :  { %v1277_v12 = vmul.f32 1.442695, %v1275_v62  ;;  %v1151_v13 = vsel %vm261_vm1, %v1931_v11, 0.0 }
 0x7b0   :  { %1152 = vadd.xlane.f32.xlu1 %v1151_v13 }
 0x7b1   :  { %1932 = vpow2.f32 %v1277_v12 }
 0x7b4   :  { %v1401_v14 = vpop.xlane.xlu0 %1400 }
 0x7b5   :  { %v1405_v29 = vsub.f32 %v2466_v36, %v1401_v14  ;;  %v1967_v14 = vld [vmem:[%s2603_s4 + $0x20] sm:$0xff] }
 0x7b7   :  { %v1933_v15 = vpop.eup %1932  ;;  %v1407_v31 = vmul.f32 1.442695, %v1405_v29 }
 0x7b8   :  { %v1281_v16 = vsel %vm261_vm1, %v1933_v15, 0.0 }
 0x7b9   :  { %1282 = vadd.xlane.f32.xlu1 %v1281_v16 }
 0x7ba   :  { %v1274_v17 = vpop.xlane.xlu1 %1273 }
 0x7bb   :  { %v1276_v18 = vsub.f32 %v1266_v50, %v1274_v17 }
 0x7bc   :  { %v1023_v19 = vpop.xlane.xlu0 %1022 }
 0x7bd   :  { %v1279_v20 = vmul.f32 1.442695, %v1276_v18  ;;  %1934 = vrcp.f32 %v1023_v19 }
 0x7bf   :  { %1936 = vpow2.f32 %v1279_v20 }
 0x7c3   :  { %v1935_v21 = vpop.eup %1934 }
 0x7c4   :  { %v1029_v22 = vmul.f32 %v1935_v21, %v1927_v49  ;;  %v1026_v9 = vpop.xlane.xlu0 %1025 }
 0x7c5   :  { %v2484_v4 = vpop.eup %1936  ;;  %1938 = vrcp.f32 %v1026_v9 }
 0x7c6   :  { %1773 = vmatmul.msk.f32.vlgmr.msra.gmra.mxu3 %vm261_vm1, %v1029_v22  ;;  %v1284_v23 = vsel %vm261_vm1, %v2484_v4, 0.0 }
 0x7c7   :  { %1285 = vadd.xlane.f32.xlu0 %v1284_v23 }
 0x7cb   :  { %v1939_v25 = vpop.eup %1938 }
 0x7cc   :  { %v1030_v10 = vmul.f32 %v1939_v25, %v1929_v53 }
 0x7ce   :  { %1774 = vmatmul.msk.f32.vlgmr.msrb.gmra.mxu0 %vm261_vm1, %v1030_v10 }
 0x7d7   :  { %v1861_v2 = vpop.permute.xlu0 %1860 }
 0x7d8   :  { %v1863_v26 = vunpack.i.h.bf16 %v1861_v2  ;;  %v1862_v27 = vunpack.i.l.bf16 %v1861_v2 }
 0x7da   :  { %1182 = vmatpush.msrb.mxu3 %v1862_v27  ;;  %1208 = vmatpush.msra.mxu0 %v1863_v26 }
 0x7db   :  { %1865 = vrot.lane.b32.xlu0 %v1864_v5, %s2139_s12 }
 0x7e4   :  { %v1144_v30 = vpop.xlane.xlu2 %1143 }
 0x7e5   :  { %v1146_v28 = vsub.f32 %v2464_v34, %v1144_v30 }
 0x7e7   :  { %v1149_v33 = vmul.f32 1.442695, %v1146_v28 }
 0x7e9   :  { %1940 = vpow2.f32 %v1149_v33 }
 0x7ea   :  { %1942 = vpow2.f32 %v1407_v31 }
 0x7ec   :  { %v1404_v32 = vpop.xlane.xlu2 %1403 }
 0x7ed   :  { %v1406_v38 = vsub.f32 %v1396_v57, %v1404_v32 }
 0x7ef   :  { %v1941_v39 = vpop.eup %1940  ;;  %v1409_v40 = vmul.f32 1.442695, %v1406_v38  ;;  %v1881_v38 = vld [vmem:[#allocation10 + $0x3] ss:$0 sm:$0xff] }
 0x7f0   :  { %v1154_v41 = vsel %vm261_vm1, %v1941_v39, 0.0  ;;  %v1943_v43 = vpop.eup %1942 }
 0x7f1   :  { %1944 = vpow2.f32 %v1409_v40  ;;  %1155 = vadd.xlane.f32.xlu1 %v1154_v41  ;;  %v1411_v46 = vsel %vm261_vm1, %v1943_v43, 0.0 }
 0x7f4   :  { %v1292_v42 = vpop.permute.xlu2 %1291 }
 0x7f5   :  { %1312 = vmatpush.msra.mxu3 %v1292_v42 }
 0x7f7   :  { %v1945_v44 = vpop.eup %1944 }
 0x7f8   :  { %v1414_v45 = vsel %vm261_vm1, %v1945_v44, 0.0 }
 0x7f9   :  { %1415 = vadd.xlane.f32.xlu2 %v1414_v45  ;;  %1412 = vadd.xlane.f32.xlu1 %v1411_v46 }
 0x812   :  { %1421 = vrot.lane.b32.xlu1 %v2326_v56, %s2138_s9 }
 0x81a   :  { %1317 = vrot.lane.b32.xlu1 %v2329_v58, %s2137_s30 }
 0x822   :  { %1447 = vrot.lane.b32.xlu1 %v2329_v58, %s2138_s9 }
 0x823   :  { %v1153_v47 = vpop.xlane.xlu1 %1152 }
 0x824   :  { %1946 = vrcp.f32 %v1153_v47 }
 0x82a   :  { %v1947_v34 = vpop.eup %1946 }
 0x82b   :  { %v1159_v48 = vmul.f32 %v1947_v34, %v1931_v11 }
 0x82c   :  { %v1283_v36 = vpop.xlane.xlu1 %1282 }
 0x82d   :  { %1948 = vrcp.f32 %v1283_v36  ;;  %1779 = vmatmul.msk.f32.vlgmr.msrb.gmra.mxu3 %vm261_vm1, %v1159_v48 }
 0x833   :  { %v1949_v8 = vpop.eup %1948 }
 0x834   :  { %v1289_v37 = vmul.f32 %v1949_v8, %v1933_v15  ;;  %v1968_v15 = vld [vmem:[%s2603_s4 + $0x8] sm:$0xff] }
 0x835   :  { %v1869_v35 = vpack.i.bf16 %v1968_v15, %v1967_v14 }
 0x836   :  { %1785 = vmatmul.msk.f32.vlgmr.msra.gmra.mxu3 %vm261_vm1, %v1289_v37 }
 0x837   :  { %1870 = vrot.lane.b32.xlu2 %v1869_v35, %s2139_s12  ;;  %v1882_v35 = vld [vmem:[#allocation10 + $0x7] ss:$0 sm:$0xff] }
 0x83a   :  { %v1286_v58 = vpop.xlane.xlu0 %1285 }
 0x849   :  { %v1054_v7 = vpop.f32.mrf.mxu3 }
 0x84b   :  { %v1080_v12 = vpop.f32.mrf.mxu0 }
 0x84d   :  { %v1866_v18 = vpop.permute.xlu0 %1865 }
 0x84e   :  { %v1868_v19 = vunpack.i.h.bf16 %v1866_v18  ;;  %v1867_v20 = vunpack.i.l.bf16 %v1866_v18 }
 0x850   :  { %1534 = vmatpush.msra.mxu1 %v1867_v20  ;;  %v1883_v20 = vld [vmem:[#allocation10 + $0x8] ss:$0 sm:$0xff] }
 0x852   :  { %1535 = vmatpush.msra.mxu1 %v1868_v19 }
 0x864   :  { %v1156_v49 = vpop.xlane.xlu1 %1155 }
 0x865   :  { %1950 = vrcp.f32 %v1156_v49 }
 0x86b   :  { %v1951_v56 = vpop.eup %1950 }
 0x86c   :  { %v1160_v50 = vmul.f32 %v1951_v56, %v1941_v39  ;;  %v1413_v51 = vpop.xlane.xlu1 %1412  ;;  %v1416_v55 = vpop.xlane.xlu2 %1415 }
 0x86d   :  { %1952 = vrcp.f32 %v1413_v51  ;;  %v128_v51 = vld [vmem:[%s2603_s4 + $0x40] sm:$0xff] }
 0x86e   :  { %1780 = vmatmul.msk.f32.vlgmr.msra.gmra.mxu0 %vm261_vm1, %v1160_v50  ;;  %1954 = vrcp.f32 %v1286_v58  ;;  %v127_v58 = vld [vmem:[%s2603_s4 + $0x28] sm:$0xff] }
 0x86f   :  { %1956 = vrcp.f32 %v1416_v55 }
 0x873   :  { %v1953_v52 = vpop.eup %1952 }
 0x874   :  { %v1419_v53 = vmul.f32 %v1953_v52, %v1943_v43  ;;  %v1955_v57 = vpop.eup %1954  ;;  %v126_v52 = vld [vmem:[%s2603_s4 + $0x10] sm:$0xff] }
 0x875   :  { %v1290_v59 = vmul.f32 %v1955_v57, %v2484_v4  ;;  %v1957_v61 = vpop.eup %1956  ;;  %v137_v57 = vld [vmem:[%s2604_s5 + $0x38] sm:$0xff] }
 0x876   :  { %v1420_v63 = vmul.f32 %v1957_v61, %v1945_v44 }
 0x884   :  { %v1422_v54 = vpop.permute.xlu1 %1421 }
 0x885   :  { %1442 = vmatpush.msrb.mxu3 %v1422_v54 }
 0x886   :  { %1791 = vmatmul.msk.f32.vlgmr.msrb.gmra.mxu3 %vm261_vm1, %v1419_v53 }
 0x887   :  { %1645 = vmatpush.msra.mxu3 %v137_v57 }
 0x88c   :  { %v1318_v60 = vpop.permute.xlu1 %1317 }
 0x88d   :  { %1338 = vmatpush.msrb.mxu0 %v1318_v60  ;;  %v135_v60 = vld [vmem:[%s2604_s5 + $0x28] sm:$0xff] }
 0x88e   :  { %1786 = vmatmul.msk.f32.vlgmr.msrb.gmra.mxu0 %vm261_vm1, %v1290_v59  ;;  %v136_v59 = vld [vmem:[%s2604_s5 + $0x30] sm:$0xff] }
 0x88f   :  { %1646 = vmatpush.msra.mxu3 %v136_v59 }
 0x891   :  { %v1871_v22 = vpop.permute.xlu2 %1870  ;;  %1647 = vmatpush.msra.mxu3 %v135_v60 }
 0x892   :  { %v1873_v9 = vunpack.i.h.bf16 %v1871_v22  ;;  %v1872_v4 = vunpack.i.l.bf16 %v1871_v22 }
 0x894   :  { %v1448_v0 = vpop.permute.xlu1 %1447  ;;  %1536 = vmatpush.msra.mxu1 %v1872_v4 }
 0x895   :  { %1468 = vmatpush.msra.mxu0 %v1448_v0  ;;  %v134_v0 = vld [vmem:[%s2604_s5 + $0x20] sm:$0xff] }
 0x896   :  { %1792 = vmatmul.msk.f32.vlgmr.msra.gmra.mxu0 %vm261_vm1, %v1420_v63  ;;  %1537 = vmatpush.msra.mxu1 %v1873_v9 }
 0x897   :  { %1648 = vmatpush.msra.mxu3 %v134_v0 }
 0x8b0   :  { %v1184_v62 = vpop.f32.mrf.mxu3 }
 0x8b1   :  { %1475 = vrot.lane.b32.xlu1 %v1184_v62, %s2123_s14  ;;  %v133_v62 = vld [vmem:[%s2604_s5 + $0x18] sm:$0xff] }
 0x8b2   :  { %1649 = vmatpush.msra.mxu3 %v133_v62  ;;  %v1886_v62 = vld [vmem:[#allocation10 + $0x9] ss:$0 sm:$0xff] }
 0x8b9   :  { %v1314_v11 = vpop.f32.mrf.mxu3 }
 0x8ba   :  { %1483 = vrot.lane.b32.xlu1 %v1314_v11, %s2132_s27 }
 0x8eb   :  { %v1210_v13 = vpop.f32.mrf.mxu0 }
 0x8ec   :  { %1477 = vrot.lane.b32.xlu0 %v1210_v13, %s2123_s14 }
 0x909   :  { %v1444_v16 = vpop.f32.mrf.mxu3 }
 0x90a   :  { %1491 = vrot.lane.b32.xlu1 %v1444_v16, %s2133_s7 }
 0x90b   :  { %v1340_v17 = vpop.f32.mrf.mxu0 }
 0x912   :  { %1485 = vrot.lane.b32.xlu1 %v1340_v17, %s2132_s27 }
 0x913   :  { %v1470_v21 = vpop.f32.mrf.mxu0 }
 0x914   :  { %1493 = vrot.lane.b32.xlu2 %v1470_v21, %s2133_s7 }
 0x923   :  { %v1476_v23 = vpop.permute.xlu1 %1475 }
 0x924   :  { %v1497_v10 = vsel %vm261_vm1, %v1054_v7, %v1476_v23 }
 0x92c   :  { %v1484_v25 = vpop.permute.xlu1 %1483 }
 0x92d   :  { %v1499_v2 = vsel %vm800_vm2, %v1497_v10, %v1484_v25 }
 0x95e   :  { %v1478_v30 = vpop.permute.xlu0 %1477 }
 0x95f   :  { %v1498_v28 = vsel %vm261_vm1, %v1080_v12, %v1478_v30  ;;  %v131_v30 = vld [vmem:[%s2604_s5 + $0x8] sm:$0xff] }
 0x96e   :  { %v1494_v33 = vpop.permute.xlu2 %1493 }
 0x97c   :  { %v1492_v26 = vpop.permute.xlu1 %1491 }
 0x97d   :  { %v1501_v27 = vsel %vm803_vm3, %v1499_v2, %v1492_v26 }
 0x97e   :  { %1793 = vmatmul.msk.f32.vlgmr.msra.gmra.mxu1 %vm169_vm0, %v1501_v27  ;;  %v132_v27 = vld [vmem:[%s2604_s5 + $0x10] sm:$0xff] }
 0x97f   :  { %1650 = vmatpush.msra.mxu3 %v132_v27 }
 0x981   :  { %1651 = vmatpush.msra.mxu3 %v131_v30 }
 0x984   :  { %v1486_v29 = vpop.permute.xlu1 %1485 }
 0x985   :  { %v1500_v31 = vsel %vm800_vm2, %v1498_v28, %v1486_v29  ;;  %v130_v28 = vld [vmem:[%s2604_s5] sm:$0xff]  ;;  %vm1630_vm2 = vcmask 523264   ;;  %s2140_s5 = smov [#allocation11]  }
 0x986   :  { %v1502_v32 = vsel %vm803_vm3, %v1500_v31, %v1494_v33  ;;  %1652 = vmatpush.msra.mxu3 %v130_v28  ;;  %v1884_v29 = vld [vmem:[%s2605_s6 + $0x2] ss:$0 sm:$0xff]  ;;  %s1718_s6 = sshll.u32 %s2140_s5, 4  ;;  %s1719_s6 = int_to_ptr.vmem [resolvable:$true] %s1718_s6 }
 0x987   :  { %1794 = vmatmul.msk.f32.gmra.mxu1 %vm169_vm0, %v1502_v32 }
 0x9fb   :  { %v1539_v39 = vpop.f32.mrf.mxu1 }
 0x9fc   :  { %v1540_v40 = vadd.f32 %v1881_v38, %v1539_v39 }
 0x9fe   :  { %v1545_v41 = vadd.f32 %v1540_v40, %v2427_v6 }
 0xa00   :  { %v1547_v42 = vsel %vm169_vm0, %v1545_v41, 0.0 }
 0xa01   :  { %1548 = vadd.xlane.f32.xlu0 %v1547_v42 }
 0xa04   :  { %v1542_v43 = vpop.f32.mrf.mxu1 }
 0xa05   :  { %v1543_v44 = vadd.f32 %v1881_v38, %v1542_v43 }
 0xa07   :  { %v1546_v45 = vadd.f32 %v1543_v44, %v2433_v3  ;;  %v129_v3 = vld [vmem:[%s2603_s4 + $0x58] sm:$0xff] }
 0xa08   :  { %1616 = vmatpush.msra.mxu2 %v129_v3 }
 0xa09   :  { %v1550_v46 = vsel %vm169_vm0, %v1546_v45, 0.0 }
 0xa0a   :  { %1551 = vadd.xlane.f32.xlu1 %v1550_v46  ;;  %1617 = vmatpush.msra.mxu2 %v128_v51 }
 0xa0c   :  { %1618 = vmatpush.msra.mxu2 %v127_v58 }
 0xa0e   :  { %1619 = vmatpush.msra.mxu2 %v126_v52 }
 0xa74   :  { %v1549_v47 = vpop.xlane.xlu0 %1548 }
 0xa75   :  { %v1553_v34 = vmul.f32 %v1549_v47, %v2406_v24 }
 0xa77   :  { %v1555_v48 = vsub.f32 %v1545_v41, %v1553_v34  ;;  %v1885_v41 = vld [vmem:[#allocation10 + $0x4] ss:$0 sm:$0xff] }
 0xa79   :  { %v1557_v36 = vmul.f32 %v1555_v48, %v1555_v48 }
 0xa7b   :  { %v1559_v8 = vsel %vm169_vm0, %v1557_v36, 0.0 }
 0xa7c   :  { %1560 = vadd.xlane.f32.xlu2 %v1559_v8 }
 0xa7d   :  { %v1552_v37 = vpop.xlane.xlu1 %1551 }
 0xa7e   :  { %v1554_v6 = vmul.f32 %v1552_v37, %v2406_v24 }
 0xa80   :  { %v1556_v49 = vsub.f32 %v1546_v45, %v1554_v6 }
 0xa82   :  { %v1558_v56 = vmul.f32 %v1556_v49, %v1556_v49 }
 0xa84   :  { %v1562_v50 = vsel %vm169_vm0, %v1558_v56, 0.0 }
 0xa85   :  { %1563 = vadd.xlane.f32.xlu0 %v1562_v50 }
 0xaef   :  { %v1561_v53 = vpop.xlane.xlu2 %1560 }
 0xaf0   :  { %v1565_v54 = vmul.f32 %v1561_v53, %v2406_v24 }
 0xaf2   :  { %v1567_v55 = vadd.f32 1e-05, %v1565_v54 }
 0xaf4   :  { %1958 = vrsqrt.f32 %v1567_v55  ;;  %vm1575_vm12 = vweird.f32 %v1567_v55 }
 0xaf8   :  { %v1564_v61 = vpop.xlane.xlu0 %1563 }
 0xaf9   :  { %v1566_v63 = vmul.f32 %v1564_v61, %v2406_v24 }
 0xafa   :  { %v1959_v1 = vpop.eup %1958 }
 0xafb   :  { %v1570_v5 = vmul.f32 %v1959_v1, %v1567_v55  ;;  %v1568_v7 = vadd.f32 1e-05, %v1566_v63  ;;  %vm1576_vm11 = vweird.f32 %v1959_v1 }
 0xafc   :  { %vm1577_vm13 = vmor %vm1575_vm12, %vm1576_vm11 }
 0xafd   :  { %v1571_v11 = vmul.f32 %v1959_v1, %v1570_v5  ;;  %1960 = vrsqrt.f32 %v1568_v7  ;;  %vm1585_vm15 = vweird.f32 %v1568_v7 }
 0xaff   :  { %v1572_v12 = vmul.f32 0.5, %v1571_v11 }
 0xb01   :  { %v1573_v13 = vsub.f32 1.5, %v1572_v12 }
 0xb03   :  { %v1961_v14 = vpop.eup %1960  ;;  %v1574_v15 = vmul.f32 %v1959_v1, %v1573_v13 }
 0xb04   :  { %v1580_v16 = vmul.f32 %v1961_v14, %v1568_v7  ;;  %vm1586_vm14 = vweird.f32 %v1961_v14 }
 0xb05   :  { %v1578_v17 = vsel %vm1577_vm13, %v1959_v1, %v1574_v15  ;;  %vm1587_vm1 = vmor %vm1585_vm15, %vm1586_vm14  ;;  %v1887_v15 = vld [vmem:[#allocation10 + $0xa] ss:$0 sm:$0xff] }
 0xb06   :  { %v1589_v18 = vmul.f32 %v1578_v17, %v1555_v48  ;;  %v1581_v19 = vmul.f32 %v1961_v14, %v1580_v16 }
 0xb08   :  { %v1592_v21 = vmul.f32 %v1882_v35, %v1589_v18  ;;  %v1582_v22 = vmul.f32 0.5, %v1581_v19 }
 0xb0a   :  { %v1583_v9 = vsub.f32 1.5, %v1582_v22  ;;  %v1595_v4 = vadd.f32 %v1883_v20, %v1592_v21 }
 0xb0c   :  { %v1584_v23 = vmul.f32 %v1961_v14, %v1583_v9  ;;  %1795 = vmatmul.msk.f32.vlgmr.msra.gmra.mxu2 %vm169_vm0, %v1595_v4 }
 0xb0e   :  { %v1588_v25 = vsel %vm1587_vm1, %v1961_v14, %v1584_v23 }
 0xb0f   :  { %v1590_v10 = vmul.f32 %v1588_v25, %v1556_v49 }
 0xb11   :  { %v1593_v2 = vmul.f32 %v1882_v35, %v1590_v10 }
 0xb13   :  { %v1596_v26 = vadd.f32 %v1883_v20, %v1593_v2 }
 0xb15   :  { %1796 = vmatmul.msk.f32.gmra.mxu2 %vm169_vm0, %v1596_v26 }
 0xb8f   :  { %v1621_v33 = vpop.f32.mrf.mxu2 }
 0xb90   :  { %v1622_v31 = vadd.f32 %v1884_v29, %v1621_v33 }
 0xb92   :  { %v1627_v32 = vmax.f32 %v1622_v31, 0.0 }
 0xb94   :  { %1797 = vmatmul.msk.f32.vlgmr.msra.gmra.mxu3 %vm1630_vm2, %v1627_v32 }
 0xb98   :  { %v1624_v38 = vpop.f32.mrf.mxu2 }
 0xb99   :  { %v1625_v39 = vadd.f32 %v1884_v29, %v1624_v38 }
 0xb9b   :  { %v1628_v40 = vmax.f32 %v1625_v39, 0.0 }
 0xb9d   :  { %1798 = vmatmul.msk.f32.gmra.mxu3 %vm1630_vm2, %v1628_v40 }
 0xc17   :  { %v1654_v42 = vpop.f32.mrf.mxu3 }
 0xc18   :  { %v1655_v43 = vadd.f32 %v1885_v41, %v1654_v42 }
 0xc1a   :  { %v1660_v44 = vadd.f32 %v1655_v43, %v1595_v4 }
 0xc1c   :  { %v1662_v45 = vsel %vm169_vm0, %v1660_v44, 0.0 }
 0xc1d   :  { %1663 = vadd.xlane.f32.xlu2 %v1662_v45 }
 0xc20   :  { %v1657_v46 = vpop.f32.mrf.mxu3 }
 0xc21   :  { %v1658_v47 = vadd.f32 %v1885_v41, %v1657_v46 }
 0xc23   :  { %v1661_v34 = vadd.f32 %v1658_v47, %v1596_v26 }
 0xc25   :  { %v1665_v48 = vsel %vm169_vm0, %v1661_v34, 0.0 }
 0xc26   :  { %1666 = vadd.xlane.f32.xlu1 %v1665_v48 }
 0xc90   :  { %v1664_v36 = vpop.xlane.xlu2 %1663 }
 0xc91   :  { %v1668_v8 = vmul.f32 %v1664_v36, %v2406_v24 }
 0xc93   :  { %v1670_v37 = vsub.f32 %v1660_v44, %v1668_v8 }
 0xc95   :  { %v1672_v6 = vmul.f32 %v1670_v37, %v1670_v37 }
 0xc97   :  { %v1674_v49 = vsel %vm169_vm0, %v1672_v6, 0.0 }
 0xc98   :  { %1675 = vadd.xlane.f32.xlu0 %v1674_v49 }
 0xc99   :  { %v1667_v56 = vpop.xlane.xlu1 %1666 }
 0xc9a   :  { %v1669_v50 = vmul.f32 %v1667_v56, %v2406_v24 }
 0xc9c   :  { %v1671_v3 = vsub.f32 %v1661_v34, %v1669_v50 }
 0xc9e   :  { %v1673_v51 = vmul.f32 %v1671_v3, %v1671_v3 }
 0xca0   :  { %v1677_v58 = vsel %vm169_vm0, %v1673_v51, 0.0 }
 0xca1   :  { %1678 = vadd.xlane.f32.xlu2 %v1677_v58 }
 0xd0b   :  { %v1676_v52 = vpop.xlane.xlu0 %1675 }
 0xd0c   :  { %v1680_v53 = vmul.f32 %v1676_v52, %v2406_v24 }
 0xd0e   :  { %v1682_v54 = vadd.f32 1e-05, %v1680_v53 }
 0xd10   :  { %1962 = vrsqrt.f32 %v1682_v54  ;;  %vm1690_vm4 = vweird.f32 %v1682_v54 }
 0xd14   :  { %v1679_v55 = vpop.xlane.xlu2 %1678 }
 0xd15   :  { %v1681_v57 = vmul.f32 %v1679_v55, %v2406_v24 }
 0xd16   :  { %v1963_v59 = vpop.eup %1962 }
 0xd17   :  { %v1685_v60 = vmul.f32 %v1963_v59, %v1682_v54  ;;  %v1683_v61 = vadd.f32 1e-05, %v1681_v57  ;;  %vm1691_vm3 = vweird.f32 %v1963_v59 }
 0xd18   :  { %vm1692_vm5 = vmor %vm1690_vm4, %vm1691_vm3 }
 0xd19   :  { %v1686_v63 = vmul.f32 %v1963_v59, %v1685_v60  ;;  %1964 = vrsqrt.f32 %v1683_v61  ;;  %vm1700_vm7 = vweird.f32 %v1683_v61 }
 0xd1b   :  { %v1687_v0 = vmul.f32 0.5, %v1686_v63 }
 0xd1d   :  { %v1688_v1 = vsub.f32 1.5, %v1687_v0 }
 0xd1f   :  { %v1965_v5 = vpop.eup %1964  ;;  %v1689_v7 = vmul.f32 %v1963_v59, %v1688_v1 }
 0xd20   :  { %v1695_v11 = vmul.f32 %v1965_v5, %v1683_v61  ;;  %vm1701_vm6 = vweird.f32 %v1965_v5 }
 0xd21   :  { %v1693_v12 = vsel %vm1692_vm5, %v1963_v59, %v1689_v7  ;;  %vm1702_vm8 = vmor %vm1700_vm7, %vm1701_vm6 }
 0xd22   :  { %v1704_v13 = vmul.f32 %v1693_v12, %v1670_v37  ;;  %v1696_v14 = vmul.f32 %v1965_v5, %v1695_v11 }
 0xd24   :  { %v1707_v35 = vmul.f32 %v1886_v62, %v1704_v13  ;;  %v1697_v24 = vmul.f32 0.5, %v1696_v14 }
 0xd26   :  { %v1698_v16 = vsub.f32 1.5, %v1697_v24  ;;  %v1710_v17 = vadd.f32 %v1887_v15, %v1707_v35 }
 0xd28   :  { %v1699_v18 = vmul.f32 %v1965_v5, %v1698_v16  ;;  %1712 = vst.msk [vmem:[#allocation11] sm:$0xff] %vm169_vm0, %v1710_v17 }
 0xd2a   :  { %v1703_v19 = vsel %vm1702_vm8, %v1965_v5, %v1699_v18 }
 0xd2b   :  { %v1705_v20 = vmul.f32 %v1703_v19, %v1671_v3 }
 0xd2d   :  { %v1708_v21 = vmul.f32 %v1886_v62, %v1705_v20 }
 0xd2f   :  { %v1711_v22 = vadd.f32 %v1887_v15, %v1708_v21 }
 0xd31   :  { %1713 = vst.msk [vmem:[#allocation11 + $0x8] sm:$0xff] %vm169_vm0, %v1711_v22 }
 0xd32   :  { %1726 = dma.vmem_to_hbm [thread:$0]  %s1719_s6, 256, %s1721_s19, [#allocation4], %s2122_s13, %s2122_s13, %s2123_s14  }
 0xd33   :  { %2119 = dma.done.wait [#allocation4], 256  }
 0xd34   :  { %2120 = vsyncadd [#allocation4], 4294967040 }
 0xd35   :  { %1731 = vsyncpa [#allocation3], 1 }
 0xd36   :  { %1732 = vsyncpa [#allocation6], 1 }
 0xd37   :  { %1733 = vsyncpa [#allocation9], 1 }
 0xd38   :  { %1734 = vsyncpa [#allocation4], 1 }

</bundles_post_ra>
